<compile_context>
chip_gen: v5e
topology: v5e:2x2
jax: 0.10.0
libtpu: 0.0.40
codegen_flags: <defaults>
</compile_context>

<pallas_src>
import functools

import jax
import jax.numpy as jnp
from jax import lax
from jax.experimental import pallas as pl
from jax.experimental.pallas import tpu as pltpu


# ----------------------------------------------------------------------------
# VMEM budget (generation-aware: ~44 MiB on v7x's 64 MiB, 48 MiB on 128 MiB
# chips), with a safe fallback if the hardware query is unavailable.
# ----------------------------------------------------------------------------
def _compute_vmem_limit():
    cap = 128 * 1024 * 1024
    try:
        cap = int(pltpu.get_tpu_info().vmem_capacity_bytes)
    except Exception:
        pass
    return max(32 * 1024 * 1024,
               min(48 * 1024 * 1024, cap - 20 * 1024 * 1024))


_VMEM_LIMIT = _compute_vmem_limit()


def _divisor_candidates(dim, candidates):
    """Candidates that evenly divide `dim` (descending), else [dim]."""
    divs = [c for c in candidates if dim >= c and dim % c == 0]
    return divs if divs else [dim]


def _largest_divisor_at_most(n, cap):
    cap = max(1, min(n, int(cap)))
    for d in range(cap, 0, -1):
        if n % d == 0:
            return d
    return 1


# ----------------------------------------------------------------------------
# Tiled matmul + bias kernel:  (M, K) @ (K, N) + (1, N)
# Used for the per-layer input projection (X @ W_ih + b) and the final Linear.
# x/w are bf16, accumulation and bias-add are f32 (MXU preferred_element_type).
# ----------------------------------------------------------------------------
def _matmul_bias_kernel(x_ref, w_ref, b_ref, o_ref):
    acc = jnp.dot(x_ref[...], w_ref[...], preferred_element_type=jnp.float32)
    o_ref[...] = (acc + b_ref[...]).astype(o_ref.dtype)


def _matmul_tiles(M, K, N, budget):
    tns = _divisor_candidates(N, (512, 256, 128))
    TN = tns[0]
    for tm in _divisor_candidates(M, (1024, 512, 256, 128, 64, 32, 16, 8)):
        # double-buffered bf16 x / bf16 w / f32 out / f32 bias tiles
        est = 2 * (tm * K * 2 + K * TN * 2 + tm * TN * 4 + TN * 4)
        if est <= budget:
            return tm, TN
    return _divisor_candidates(M, (8,))[-1], TN


def matmul_bias_pallas(x, w_t, b, out_dtype=jnp.float32):
    M, K = x.shape
    _, N = w_t.shape
    TM, TN = _matmul_tiles(M, K, N, budget=_VMEM_LIMIT // 2)

    x_bytes = x.size * x.dtype.itemsize
    w_bytes = w_t.size * w_t.dtype.itemsize

    if w_bytes >= x_bytes:
        # Keep the (bigger) W tile resident across the inner M axis: W is
        # streamed from HBM exactly once, X is re-read N/TN times.
        grid = (N // TN, M // TM)
        in_specs = [pl.BlockSpec((TM, K), lambda j, i: (i, 0)),
                    pl.BlockSpec((K, TN), lambda j, i: (0, j)),
                    pl.BlockSpec((1, TN), lambda j, i: (0, j))]
        out_specs = pl.BlockSpec((TM, TN), lambda j, i: (i, j))
    else:
        # Keep the (bigger) X tile resident across the inner N axis.
        grid = (M // TM, N // TN)
        in_specs = [pl.BlockSpec((TM, K), lambda i, j: (i, 0)),
                    pl.BlockSpec((K, TN), lambda i, j: (0, j)),
                    pl.BlockSpec((1, TN), lambda i, j: (0, j))]
        out_specs = pl.BlockSpec((TM, TN), lambda i, j: (i, j))

    return pl.pallas_call(
        _matmul_bias_kernel,
        out_shape=jax.ShapeDtypeStruct((M, N), out_dtype),
        grid_spec=pltpu.PrefetchScalarGridSpec(
            num_scalar_prefetch=0,
            grid=grid,
            in_specs=in_specs,
            out_specs=out_specs,
        ),
        compiler_params=pltpu.CompilerParams(
            dimension_semantics=("parallel", "parallel"),
            vmem_limit_bytes=_VMEM_LIMIT),
    )(x, w_t, b)


# ----------------------------------------------------------------------------
# LSTM recurrence kernel.
# gates_x = X @ W_ih + b is PRE-computed (bf16) for the whole sequence, so the
# in-kernel time loop only does h @ W_hh (bf16 MXU, f32 acc) + nonlinearities.
# Grid: (batch blocks "parallel", sequence chunks "arbitrary"); h/c live in
# f32 VMEM scratch and persist across the seq-chunk axis.
# Gate order along the 4H axis is [i, f, o, g]  (sigmoid slab, then tanh).
# ----------------------------------------------------------------------------
def _lstm_recurrence_kernel(gx_ref, whh_t_ref, h0_ref, c0_ref,
                            y_ref, hn_ref, cn_ref, h_scr, c_scr):
    H = h_scr.shape[-1]
    t_chunk = gx_ref.shape[0]
    s = pl.program_id(1)

    @pl.when(s == 0)
    def _():
        h_scr[...] = h0_ref[...]
        c_scr[...] = c0_ref[...]

    def step(t, carry):
        h = h_scr[...]
        c = c_scr[...]
        # bf16 gx + f32 MXU accumulation; W_hh is streamed from VMEM inside
        # the dot (no hoisted materialization of the full (H, 4H) weight).
        gates = gx_ref[t] + jnp.dot(h.astype(whh_t_ref.dtype),
                                    whh_t_ref[...],
                                    preferred_element_type=jnp.float32)
        # Nonlinearities kept in f32 (safe on v5e's f32-only VPU/EUP).
        sig = jax.nn.sigmoid(gates[:, :3 * H])        # contiguous [i, f, o]
        i_g = sig[:, 0 * H:1 * H]
        f_g = sig[:, 1 * H:2 * H]
        o_g = sig[:, 2 * H:3 * H]
        g_g = jnp.tanh(gates[:, 3 * H:4 * H])
        c_new = f_g * c + i_g * g_g
        h_new = o_g * jnp.tanh(c_new)
        h_scr[...] = h_new
        c_scr[...] = c_new
        y_ref[t] = h_new.astype(y_ref.dtype)
        return carry

    unroll = True if t_chunk <= 16 else 8
    lax.fori_loop(0, t_chunk, step, 0, unroll=unroll)

    # h_n/c_n are resident accumulator blocks: only copy scratch out once,
    # on the last sequence chunk.
    @pl.when(s == pl.num_programs(1) - 1)
    def _():
        hn_ref[...] = h_scr[...]
        cn_ref[...] = c_scr[...]


def _recurrence_batch_block(B):
    # Split the padded batch across TensorCores (v7x has 2 TCs) when it is
    # big enough; keep blocks a multiple of 16 for bf16 sublane packing.
    if B >= 32 and B % 32 == 0:
        return B // 2
    return B


def _recurrence_t_chunk(seq_len, B_blk, H, vmem_limit):
    budget = vmem_limit // 2
    fixed = 2 * (H * 4 * H * 2)             # W_hh bf16, double-buffered
    fixed += 4 * 2 * (B_blk * H * 4)        # h0/c0/hn/cn f32, double-buffered
    fixed += 2 * (B_blk * H * 4)            # h/c scratch
    per_t = 2 * (B_blk * 4 * H * 2 + B_blk * H * 2)   # gx + y bf16, x2 buffers
    t_cap = max(1, (budget - fixed) // max(1, per_t))
    return _largest_divisor_at_most(seq_len, min(t_cap, 128))


def lstm_recurrence_pallas(gates_x, whh_t, h0, c0):
    seq_len, B, G = gates_x.shape
    H = h0.shape[-1]
    B_blk = _recurrence_batch_block(B)
    t_chunk = _recurrence_t_chunk(seq_len, B_blk, H, _VMEM_LIMIT)
    grid = (B // B_blk, seq_len // t_chunk)

    out_shape = (
        jax.ShapeDtypeStruct((seq_len, B, H), jnp.bfloat16),   # per-step h
        jax.ShapeDtypeStruct((B, H), jnp.float32),             # h_n
        jax.ShapeDtypeStruct((B, H), jnp.float32),             # c_n
    )
    return pl.pallas_call(
        _lstm_recurrence_kernel,
        out_shape=out_shape,
        grid_spec=pltpu.PrefetchScalarGridSpec(
            num_scalar_prefetch=0,
            grid=grid,
            in_specs=[pl.BlockSpec((t_chunk, B_blk, G), lambda b, s: (s, b, 0)),
                      pl.BlockSpec((H, G), lambda b, s: (0, 0)),
                      pl.BlockSpec((B_blk, H), lambda b, s: (b, 0)),
                      pl.BlockSpec((B_blk, H), lambda b, s: (b, 0))],
            out_specs=[pl.BlockSpec((t_chunk, B_blk, H), lambda b, s: (s, b, 0)),
                       pl.BlockSpec((B_blk, H), lambda b, s: (b, 0)),
                       pl.BlockSpec((B_blk, H), lambda b, s: (b, 0))],
            scratch_shapes=[pltpu.VMEM((B_blk, H), jnp.float32),
                            pltpu.VMEM((B_blk, H), jnp.float32)]),
        compiler_params=pltpu.CompilerParams(
            dimension_semantics=("parallel", "arbitrary"),
            vmem_limit_bytes=_VMEM_LIMIT),
    )(gates_x, whh_t, h0, c0)


# ----------------------------------------------------------------------------
# Parameter init (PyTorch-convention raw params) + host-side preparation
# (transpose, gate permutation [i,f,g,o]->[i,f,o,g], bias fusion, bf16 cast,
# vocab padding to a lane multiple).
# ----------------------------------------------------------------------------
def init_params(key, vocab_size, embedding_dim, hidden_dim, num_layers):
    keys = jax.random.split(key, 3 + 4 * num_layers)
    scale = 1.0 / jnp.sqrt(hidden_dim)
    params = {
        "embedding": jax.random.normal(keys[0], (vocab_size, embedding_dim),
                                       jnp.float32) * 0.1,
        "linear_w": jax.random.uniform(keys[1], (vocab_size, hidden_dim),
                                       jnp.float32, -scale, scale),
        "linear_b": jax.random.uniform(keys[2], (vocab_size,),
                                       jnp.float32, -scale, scale),
        "lstm": [],
    }
    for layer in range(num_layers):
        in_dim = embedding_dim if layer == 0 else hidden_dim
        k = keys[3 + 4 * layer: 3 + 4 * (layer + 1)]
        params["lstm"].append({
            "w_ih": jax.random.uniform(k[0], (4 * hidden_dim, in_dim),
                                       jnp.float32, -scale, scale),
            "w_hh": jax.random.uniform(k[1], (4 * hidden_dim, hidden_dim),
                                       jnp.float32, -scale, scale),
            "b_ih": jax.random.uniform(k[2], (4 * hidden_dim,),
                                       jnp.float32, -scale, scale),
            "b_hh": jax.random.uniform(k[3], (4 * hidden_dim,),
                                       jnp.float32, -scale, scale),
        })
    return params


def _permute_gates_ifog(x):
    """Permute the leading 4H axis from PyTorch [i,f,g,o] to [i,f,o,g]."""
    H = x.shape[0] // 4
    return jnp.concatenate([x[:2 * H], x[3 * H:4 * H], x[2 * H:3 * H]], axis=0)


def prepare_params(raw):
    """One-time host-side prep: transpose to (in,out), permute gate order,
    pre-sum the two LSTM biases, cast weights to bf16, pad vocab to 128."""
    vocab = raw["linear_w"].shape[0]
    vocab_pad = (-vocab) % 128
    lw_t = raw["linear_w"].T                                   # (H, vocab)
    lb = raw["linear_b"]
    if vocab_pad:
        lw_t = jnp.pad(lw_t, ((0, 0), (0, vocab_pad)))
        lb = jnp.pad(lb, (0, vocab_pad))
    prepped = {
        "embedding": raw["embedding"].astype(jnp.bfloat16),
        "linear_w_t": lw_t.astype(jnp.bfloat16),               # (H, vocab_p)
        "linear_b": lb.reshape(1, -1).astype(jnp.float32),     # (1, vocab_p)
        "lstm": [],
    }
    for p in raw["lstm"]:
        w_ih = _permute_gates_ifog(p["w_ih"])                  # (4H, in)
        w_hh = _permute_gates_ifog(p["w_hh"])                  # (4H, H)
        b = _permute_gates_ifog(p["b_ih"] + p["b_hh"])         # (4H,)
        prepped["lstm"].append({
            "w_ih_t": w_ih.T.astype(jnp.bfloat16),             # (in, 4H)
            "w_hh_t": w_hh.T.astype(jnp.bfloat16),             # (H, 4H)
            "b": b.reshape(1, -1).astype(jnp.float32),         # (1, 4H)
        })
    return prepped


# ----------------------------------------------------------------------------
# Model forward (matches PyTorch PoetryModel.forward semantics)
# ----------------------------------------------------------------------------
@functools.partial(jax.jit,
                   static_argnames=("hidden_dim", "num_layers", "vocab_size"))
def poetry_model_forward(params, tokens, hidden_dim, num_layers, vocab_size,
                         hidden=None):
    seq_len, batch = tokens.shape
    H = hidden_dim

    # Pad batch to 16 sublanes (bf16 vreg packing) for dense vector ops.
    pad_b = (-batch) % 16
    B = batch + pad_b
    tokens_p = jnp.pad(tokens, ((0, 0), (0, pad_b))) if pad_b else tokens

    if hidden is None:
        h0p = jnp.zeros((num_layers, B, H), jnp.float32)
        c0p = jnp.zeros((num_layers, B, H), jnp.float32)
    else:
        h_0, c_0 = hidden
        if pad_b:
            h0p = jnp.pad(h_0, ((0, 0), (0, pad_b), (0, 0)))
            c0p = jnp.pad(c_0, ((0, 0), (0, pad_b), (0, 0)))
        else:
            h0p, c0p = h_0, c_0

    # Embedding lookup (plain-JAX gather glue), bf16: (seq, B, emb)
    # TODO(synk): could fold the gather into the first projection kernel via
    # scalar-prefetched token ids + pl.Element row gather; left to XLA here.
    embeds = jnp.take(params["embedding"], tokens_p, axis=0)

    x = embeds
    h_n, c_n = [], []
    for layer in range(num_layers):
        p = params["lstm"][layer]
        in_dim = x.shape[-1]
        # Hoisted input projection: one big bf16 MXU matmul over the whole
        # sequence (bias + broadcast folded in, outside the serial loop).
        gates_x = matmul_bias_pallas(x.reshape(seq_len * B, in_dim),
                                     p["w_ih_t"], p["b"],
                                     out_dtype=jnp.bfloat16)
        gates_x = gates_x.reshape(seq_len, B, 4 * H)
        # Serial recurrence: only h @ W_hh + nonlinearities per step.
        y, hn, cn = lstm_recurrence_pallas(gates_x, p["w_hh_t"],
                                           h0p[layer], c0p[layer])
        x = y
        h_n.append(hn)
        c_n.append(cn)

    h_n = jnp.stack(h_n, axis=0)[:, :batch]
    c_n = jnp.stack(c_n, axis=0)[:, :batch]

    # Final linear: (seq*B, H) -> (seq*B, vocab_pad), then drop padding.
    logits_p = matmul_bias_pallas(x.reshape(seq_len * B, H),
                                  params["linear_w_t"], params["linear_b"],
                                  out_dtype=jnp.float32)
    vocab_p = logits_p.shape[-1]
    logits = logits_p.reshape(seq_len, B, vocab_p)[:, :batch, :vocab_size]
    logits = logits.reshape(seq_len * batch, vocab_size)
    return logits, (h_n, c_n)


# ----------------------------------------------------------------------------
# Pure-JAX f32 reference (PyTorch nn.LSTM semantics, raw params).
# ----------------------------------------------------------------------------
def reference_forward(raw, tokens, hidden_dim, num_layers):
    seq_len, batch = tokens.shape
    embeds = jnp.take(raw["embedding"], tokens, axis=0)
    x = embeds
    h_n, c_n = [], []
    for layer in range(num_layers):
        p = raw["lstm"][layer]
        H = hidden_dim
        h = jnp.zeros((batch, H), jnp.float32)
        c = jnp.zeros((batch, H), jnp.float32)
        ys = []
        for t in range(seq_len):
            gates = x[t] @ p["w_ih"].T + h @ p["w_hh"].T + p["b_ih"] + p["b_hh"]
            i_g = jax.nn.sigmoid(gates[:, 0 * H:1 * H])
            f_g = jax.nn.sigmoid(gates[:, 1 * H:2 * H])
            g_g = jnp.tanh(gates[:, 2 * H:3 * H])
            o_g = jax.nn.sigmoid(gates[:, 3 * H:4 * H])
            c = f_g * c + i_g * g_g
            h = o_g * jnp.tanh(c)
            ys.append(h)
        x = jnp.stack(ys, axis=0)
        h_n.append(h)
        c_n.append(c)
    flat = x.reshape(seq_len * batch, hidden_dim)
    logits = flat @ raw["linear_w"].T + raw["linear_b"]
    return logits, (jnp.stack(h_n, 0), jnp.stack(c_n, 0))


if __name__ == "__main__":
    vocab_size, embedding_dim, hidden_dim, num_layers = 64, 32, 32, 2
    seq_len, batch = 8, 4

    key = jax.random.PRNGKey(0)
    pkey, tkey = jax.random.split(key)
    raw_params = init_params(pkey, vocab_size, embedding_dim, hidden_dim,
                             num_layers)
    params = prepare_params(raw_params)
    tokens = jax.random.randint(tkey, (seq_len, batch), 0, vocab_size,
                                jnp.int32)

    logits, (h_n, c_n) = poetry_model_forward(params, tokens,
                                              hidden_dim, num_layers,
                                              vocab_size)
    jax.block_until_ready((logits, h_n, c_n))

    ref_logits, (ref_h, ref_c) = reference_forward(raw_params, tokens,
                                                   hidden_dim, num_layers)
    assert logits.shape == (seq_len * batch, vocab_size)
    assert h_n.shape == (num_layers, batch, hidden_dim)
    assert c_n.shape == (num_layers, batch, hidden_dim)
    # bf16 weights/activations -> loosened tolerances vs. the f32 reference.
    assert jnp.allclose(logits, ref_logits, atol=5e-2, rtol=5e-2)
    assert jnp.allclose(h_n, ref_h, atol=5e-2, rtol=5e-2)
    assert jnp.allclose(c_n, ref_c, atol=5e-2, rtol=5e-2)

    print("KERNEL_OK")
</pallas_src>

<mosaic_0001>
module attributes {stable_mosaic.version = 11 : i64} {
  func.func @_matmul_bias_kernel(%arg0: i32, %arg1: i32, %arg2: memref<128x32xbf16, #tpu.memory_space<vmem>>, %arg3: memref<32x128xbf16, #tpu.memory_space<vmem>>, %arg4: memref<1x128xf32, #tpu.memory_space<vmem>>, %arg5: memref<128x128xbf16, #tpu.memory_space<vmem>>) attributes {dimension_semantics = [#tpu.dimension_semantics<parallel>, #tpu.dimension_semantics<parallel>], iteration_bounds = array<i64: 1, 1>, scalar_prefetch = 0 : i64, scratch_operands = 0 : i64, tpu.core_type = #tpu.core_type<tc>, window_params = [{transform_indices = @transform_0, window_bounds = array<i64: 128, 32>}, {transform_indices = @transform_1, window_bounds = array<i64: 32, 128>}, {transform_indices = @transform_2, window_bounds = array<i64: 1, 128>}, {transform_indices = @transform_3, window_bounds = array<i64: 128, 128>}]} {
    %c0 = arith.constant 0 : index
    %c0_0 = arith.constant 0 : index
    %0 = vector.load %arg2[%c0, %c0_0] : memref<128x32xbf16, #tpu.memory_space<vmem>>, vector<128x32xbf16>
    %c0_1 = arith.constant 0 : index
    %c0_2 = arith.constant 0 : index
    %1 = vector.load %arg3[%c0_1, %c0_2] : memref<32x128xbf16, #tpu.memory_space<vmem>>, vector<32x128xbf16>
    %cst = arith.constant dense<0.000000e+00> : vector<128x128xf32>
    %2 = tpu.matmul %0, %1, %cst {dimension_numbers = #tpu.dot_dimension_numbers<[1], [0], [0], [1], [0, 0, 1, 1], [], []>} : vector<128x32xbf16>, vector<32x128xbf16>, vector<128x128xf32> -> vector<128x128xf32>
    %c0_3 = arith.constant 0 : index
    %c0_4 = arith.constant 0 : index
    %3 = vector.load %arg4[%c0_3, %c0_4] : memref<1x128xf32, #tpu.memory_space<vmem>>, vector<1x128xf32>
    %4 = vector.broadcast %3 : vector<1x128xf32> to vector<128x128xf32>
    %5 = arith.addf %2, %4 : vector<128x128xf32>
    %6 = arith.truncf %5 : vector<128x128xf32> to vector<128x128xbf16>
    %c0_5 = arith.constant 0 : index
    %c0_6 = arith.constant 0 : index
    %7 = vector.load %arg5[%c0_5, %c0_6] : memref<128x128xbf16, #tpu.memory_space<vmem>>, vector<128x128xbf16>
    tpu.vector_store %arg5[%c0_5, %c0_6], %6 {strides = array<i32>} : memref<128x128xbf16, #tpu.memory_space<vmem>>, vector<128x128xbf16>,
    return
  }
  func.func @transform_0(%arg0: i32, %arg1: i32) -> (i32, i32) {
    %c0_i32 = arith.constant 0 : i32
    %c0_i32_0 = arith.constant 0 : i32
    return %arg1, %c0_i32 : i32, i32
  }
  func.func @transform_1(%arg0: i32, %arg1: i32) -> (i32, i32) {
    %c0_i32 = arith.constant 0 : i32
    %c0_i32_0 = arith.constant 0 : i32
    return %c0_i32, %arg0 : i32, i32
  }
  func.func @transform_2(%arg0: i32, %arg1: i32) -> (i32, i32) {
    %c0_i32 = arith.constant 0 : i32
    %c0_i32_0 = arith.constant 0 : i32
    return %c0_i32, %arg0 : i32, i32
  }
  func.func @transform_3(%arg0: i32, %arg1: i32) -> (i32, i32) {
    %c0_i32 = arith.constant 0 : i32
    return %arg1, %arg0 : i32, i32
  }
}

module attributes {stable_mosaic.version = 11 : i64} {
  func.func @_matmul_bias_kernel(%arg0: i32, %arg1: i32, %arg2: memref<128x32xbf16, #tpu.memory_space<vmem>>, %arg3: memref<32x128xbf16, #tpu.memory_space<vmem>>, %arg4: memref<1x128xf32, #tpu.memory_space<vmem>>, %arg5: memref<128x128xf32, #tpu.memory_space<vmem>>) attributes {dimension_semantics = [#tpu.dimension_semantics<parallel>, #tpu.dimension_semantics<parallel>], iteration_bounds = array<i64: 1, 1>, scalar_prefetch = 0 : i64, scratch_operands = 0 : i64, tpu.core_type = #tpu.core_type<tc>, window_params = [{transform_indices = @transform_0, window_bounds = array<i64: 128, 32>}, {transform_indices = @transform_1, window_bounds = array<i64: 32, 128>}, {transform_indices = @transform_2, window_bounds = array<i64: 1, 128>}, {transform_indices = @transform_3, window_bounds = array<i64: 128, 128>}]} {
    %c0 = arith.constant 0 : index
    %c0_0 = arith.constant 0 : index
    %0 = vector.load %arg2[%c0, %c0_0] : memref<128x32xbf16, #tpu.memory_space<vmem>>, vector<128x32xbf16>
    %c0_1 = arith.constant 0 : index
    %c0_2 = arith.constant 0 : index
    %1 = vector.load %arg3[%c0_1, %c0_2] : memref<32x128xbf16, #tpu.memory_space<vmem>>, vector<32x128xbf16>
    %cst = arith.constant dense<0.000000e+00> : vector<128x128xf32>
    %2 = tpu.matmul %0, %1, %cst {dimension_numbers = #tpu.dot_dimension_numbers<[1], [0], [0], [1], [0, 0, 1, 1], [], []>} : vector<128x32xbf16>, vector<32x128xbf16>, vector<128x128xf32> -> vector<128x128xf32>
    %c0_3 = arith.constant 0 : index
    %c0_4 = arith.constant 0 : index
    %3 = vector.load %arg4[%c0_3, %c0_4] : memref<1x128xf32, #tpu.memory_space<vmem>>, vector<1x128xf32>
    %4 = vector.broadcast %3 : vector<1x128xf32> to vector<128x128xf32>
    %5 = arith.addf %2, %4 : vector<128x128xf32>
    %c0_5 = arith.constant 0 : index
    %c0_6 = arith.constant 0 : index
    %6 = vector.load %arg5[%c0_5, %c0_6] : memref<128x128xf32, #tpu.memory_space<vmem>>, vector<128x128xf32>
    tpu.vector_store %arg5[%c0_5, %c0_6], %5 {strides = array<i32>} : memref<128x128xf32, #tpu.memory_space<vmem>>, vector<128x128xf32>,
    return
  }
  func.func @transform_0(%arg0: i32, %arg1: i32) -> (i32, i32) {
    %c0_i32 = arith.constant 0 : i32
    %c0_i32_0 = arith.constant 0 : i32
    return %arg1, %c0_i32 : i32, i32
  }
  func.func @transform_1(%arg0: i32, %arg1: i32) -> (i32, i32) {
    %c0_i32 = arith.constant 0 : i32
    %c0_i32_0 = arith.constant 0 : i32
    return %c0_i32, %arg0 : i32, i32
  }
  func.func @transform_2(%arg0: i32, %arg1: i32) -> (i32, i32) {
    %c0_i32 = arith.constant 0 : i32
    %c0_i32_0 = arith.constant 0 : i32
    return %c0_i32, %arg0 : i32, i32
  }
  func.func @transform_3(%arg0: i32, %arg1: i32) -> (i32, i32) {
    %c0_i32 = arith.constant 0 : i32
    return %arg1, %arg0 : i32, i32
  }
}

module attributes {stable_mosaic.version = 11 : i64} {
  func.func @_lstm_recurrence_kernel(%arg0: i32, %arg1: i32, %arg2: memref<8x16x128xbf16, #tpu.memory_space<vmem>>, %arg3: memref<32x128xbf16, #tpu.memory_space<vmem>>, %arg4: memref<16x32xf32, #tpu.memory_space<vmem>>, %arg5: memref<16x32xf32, #tpu.memory_space<vmem>>, %arg6: memref<8x16x32xbf16, #tpu.memory_space<vmem>>, %arg7: memref<16x32xf32, #tpu.memory_space<vmem>>, %arg8: memref<16x32xf32, #tpu.memory_space<vmem>>, %arg9: memref<16x32xf32, #tpu.memory_space<vmem>>, %arg10: memref<16x32xf32, #tpu.memory_space<vmem>>) attributes {dimension_semantics = [#tpu.dimension_semantics<parallel>, #tpu.dimension_semantics<arbitrary>], iteration_bounds = array<i64: 1, 1>, scalar_prefetch = 0 : i64, scratch_operands = 2 : i64, tpu.core_type = #tpu.core_type<tc>, window_params = [{transform_indices = @transform_0, window_bounds = array<i64: 8, 16, 128>}, {pipeline_mode = #tpu.pipeline_mode<synchronous>, transform_indices = @transform_1, window_bounds = array<i64: 32, 128>}, {transform_indices = @transform_2, window_bounds = array<i64: 16, 32>}, {transform_indices = @transform_3, window_bounds = array<i64: 16, 32>}, {transform_indices = @transform_4, window_bounds = array<i64: 8, 16, 32>}, {transform_indices = @transform_5, window_bounds = array<i64: 16, 32>}, {transform_indices = @transform_6, window_bounds = array<i64: 16, 32>}]} {
    %c0_i32 = arith.constant 0 : i32
    %0 = arith.cmpi eq, %arg1, %c0_i32 : i32
    %1 = arith.extui %0 : i1 to i32
    %c0_i32_0 = arith.constant 0 : i32
    %2 = arith.cmpi ne, %1, %c0_i32_0 : i32
    scf.if %2 {
      %c0_130 = arith.constant 0 : index
      %c0_131 = arith.constant 0 : index
      %270 = vector.load %arg4[%c0_130, %c0_131] : memref<16x32xf32, #tpu.memory_space<vmem>>, vector<16x32xf32>
      %c0_132 = arith.constant 0 : index
      %c0_133 = arith.constant 0 : index
      %271 = vector.load %arg9[%c0_132, %c0_133] : memref<16x32xf32, #tpu.memory_space<vmem>>, vector<16x32xf32>
      tpu.vector_store %arg9[%c0_132, %c0_133], %270 {strides = array<i32>} : memref<16x32xf32, #tpu.memory_space<vmem>>, vector<16x32xf32>,
      %c0_134 = arith.constant 0 : index
      %c0_135 = arith.constant 0 : index
      %272 = vector.load %arg5[%c0_134, %c0_135] : memref<16x32xf32, #tpu.memory_space<vmem>>, vector<16x32xf32>
      %c0_136 = arith.constant 0 : index
      %c0_137 = arith.constant 0 : index
      %273 = vector.load %arg10[%c0_136, %c0_137] : memref<16x32xf32, #tpu.memory_space<vmem>>, vector<16x32xf32>
      tpu.vector_store %arg10[%c0_136, %c0_137], %272 {strides = array<i32>} : memref<16x32xf32, #tpu.memory_space<vmem>>, vector<16x32xf32>,
    } else {
    }
    %c0_i32_1 = arith.constant 0 : i32
    %c0 = arith.constant 0 : index
    %c0_2 = arith.constant 0 : index
    %3 = vector.load %arg9[%c0, %c0_2] : memref<16x32xf32, #tpu.memory_space<vmem>>, vector<16x32xf32>
    %c0_3 = arith.constant 0 : index
    %c0_4 = arith.constant 0 : index
    %4 = vector.load %arg10[%c0_3, %c0_4] : memref<16x32xf32, #tpu.memory_space<vmem>>, vector<16x32xf32>
    %5 = arith.index_cast %c0_i32_1 : i32 to index
    %c0_5 = arith.constant 0 : index
    %c0_6 = arith.constant 0 : index
    %6 = vector.load %arg2[%5, %c0_5, %c0_6] : memref<8x16x128xbf16, #tpu.memory_space<vmem>>, vector<1x16x128xbf16>
    %7 = vector.shape_cast %6 : vector<1x16x128xbf16> to vector<16x128xbf16>
    %8 = arith.truncf %3 : vector<16x32xf32> to vector<16x32xbf16>
    %c0_7 = arith.constant 0 : index
    %c0_8 = arith.constant 0 : index
    %9 = vector.load %arg3[%c0_7, %c0_8] : memref<32x128xbf16, #tpu.memory_space<vmem>>, vector<32x128xbf16>
    %cst = arith.constant dense<0.000000e+00> : vector<16x128xf32>
    %10 = tpu.matmul %8, %9, %cst {dimension_numbers = #tpu.dot_dimension_numbers<[1], [0], [0], [1], [0, 0, 1, 1], [], []>} : vector<16x32xbf16>, vector<32x128xbf16>, vector<16x128xf32> -> vector<16x128xf32>
    %11 = arith.extf %7 : vector<16x128xbf16> to vector<16x128xf32>
    %12 = arith.addf %11, %10 : vector<16x128xf32>
    %13 = vector.extract_strided_slice %12 {offsets = [0, 0], sizes = [16, 96], strides = [1, 1]} : vector<16x128xf32> to vector<16x96xf32>
    %14 = arith.negf %13 : vector<16x96xf32>
    %15 = math.exp %14 : vector<16x96xf32>
    %cst_9 = arith.constant 1.000000e+00 : f32
    %16 = vector.broadcast %cst_9 : f32 to vector<16x96xf32>
    %17 = arith.addf %16, %15 : vector<16x96xf32>
    %18 = arith.divf %16, %17 : vector<16x96xf32>
    %19 = vector.extract_strided_slice %18 {offsets = [0, 0], sizes = [16, 32], strides = [1, 1]} : vector<16x96xf32> to vector<16x32xf32>
    %20 = vector.extract_strided_slice %18 {offsets = [0, 32], sizes = [16, 32], strides = [1, 1]} : vector<16x96xf32> to vector<16x32xf32>
    %21 = vector.extract_strided_slice %18 {offsets = [0, 64], sizes = [16, 32], strides = [1, 1]} : vector<16x96xf32> to vector<16x32xf32>
    %22 = vector.extract_strided_slice %12 {offsets = [0, 96], sizes = [16, 32], strides = [1, 1]} : vector<16x128xf32> to vector<16x32xf32>
    %23 = math.tanh %22 : vector<16x32xf32>
    %24 = arith.mulf %20, %4 : vector<16x32xf32>
    %25 = arith.mulf %19, %23 : vector<16x32xf32>
    %26 = arith.addf %24, %25 : vector<16x32xf32>
    %27 = math.tanh %26 : vector<16x32xf32>
    %28 = arith.mulf %21, %27 : vector<16x32xf32>
    %c0_10 = arith.constant 0 : index
    %c0_11 = arith.constant 0 : index
    %29 = vector.load %arg9[%c0_10, %c0_11] : memref<16x32xf32, #tpu.memory_space<vmem>>, vector<16x32xf32>
    tpu.vector_store %arg9[%c0_10, %c0_11], %28 {strides = array<i32>} : memref<16x32xf32, #tpu.memory_space<vmem>>, vector<16x32xf32>,
    %c0_12 = arith.constant 0 : index
    %c0_13 = arith.constant 0 : index
    %30 = vector.load %arg10[%c0_12, %c0_13] : memref<16x32xf32, #tpu.memory_space<vmem>>, vector<16x32xf32>
    tpu.vector_store %arg10[%c0_12, %c0_13], %26 {strides = array<i32>} : memref<16x32xf32, #tpu.memory_space<vmem>>, vector<16x32xf32>,
    %31 = arith.truncf %28 : vector<16x32xf32> to vector<16x32xbf16>
    %32 = arith.index_cast %c0_i32_1 : i32 to index
    %c0_14 = arith.constant 0 : index
    %c0_15 = arith.constant 0 : index
    %33 = vector.load %arg6[%32, %c0_14, %c0_15] : memref<8x16x32xbf16, #tpu.memory_space<vmem>>, vector<1x16x32xbf16>
    %34 = vector.shape_cast %33 : vector<1x16x32xbf16> to vector<16x32xbf16>
    %35 = vector.shape_cast %31 : vector<16x32xbf16> to vector<1x16x32xbf16>
    tpu.vector_store %arg6[%32, %c0_14, %c0_15], %35 {strides = array<i32>} : memref<8x16x32xbf16, #tpu.memory_space<vmem>>, vector<1x16x32xbf16>,
    %c1_i32 = arith.constant 1 : i32
    %c0_16 = arith.constant 0 : index
    %c0_17 = arith.constant 0 : index
    %36 = vector.load %arg9[%c0_16, %c0_17] : memref<16x32xf32, #tpu.memory_space<vmem>>, vector<16x32xf32>
    %c0_18 = arith.constant 0 : index
    %c0_19 = arith.constant 0 : index
    %37 = vector.load %arg10[%c0_18, %c0_19] : memref<16x32xf32, #tpu.memory_space<vmem>>, vector<16x32xf32>
    %38 = arith.index_cast %c1_i32 : i32 to index
    %c0_20 = arith.constant 0 : index
    %c0_21 = arith.constant 0 : index
    %39 = vector.load %arg2[%38, %c0_20, %c0_21] : memref<8x16x128xbf16, #tpu.memory_space<vmem>>, vector<1x16x128xbf16>
    %40 = vector.shape_cast %39 : vector<1x16x128xbf16> to vector<16x128xbf16>
    %41 = arith.truncf %36 : vector<16x32xf32> to vector<16x32xbf16>
    %c0_22 = arith.constant 0 : index
    %c0_23 = arith.constant 0 : index
    %42 = vector.load %arg3[%c0_22, %c0_23] : memref<32x128xbf16, #tpu.memory_space<vmem>>, vector<32x128xbf16>
    %cst_24 = arith.constant dense<0.000000e+00> : vector<16x128xf32>
    %43 = tpu.matmul %41, %42, %cst_24 {dimension_numbers = #tpu.dot_dimension_numbers<[1], [0], [0], [1], [0, 0, 1, 1], [], []>} : vector<16x32xbf16>, vector<32x128xbf16>, vector<16x128xf32> -> vector<16x128xf32>
    %44 = arith.extf %40 : vector<16x128xbf16> to vector<16x128xf32>
    %45 = arith.addf %44, %43 : vector<16x128xf32>
    %46 = vector.extract_strided_slice %45 {offsets = [0, 0], sizes = [16, 96], strides = [1, 1]} : vector<16x128xf32> to vector<16x96xf32>
    %47 = arith.negf %46 : vector<16x96xf32>
    %48 = math.exp %47 : vector<16x96xf32>
    %cst_25 = arith.constant 1.000000e+00 : f32
    %49 = vector.broadcast %cst_25 : f32 to vector<16x96xf32>
    %50 = arith.addf %49, %48 : vector<16x96xf32>
    %51 = arith.divf %49, %50 : vector<16x96xf32>
    %52 = vector.extract_strided_slice %51 {offsets = [0, 0], sizes = [16, 32], strides = [1, 1]} : vector<16x96xf32> to vector<16x32xf32>
    %53 = vector.extract_strided_slice %51 {offsets = [0, 32], sizes = [16, 32], strides = [1, 1]} : vector<16x96xf32> to vector<16x32xf32>
    %54 = vector.extract_strided_slice %51 {offsets = [0, 64], sizes = [16, 32], strides = [1, 1]} : vector<16x96xf32> to vector<16x32xf32>
    %55 = vector.extract_strided_slice %45 {offsets = [0, 96], sizes = [16, 32], strides = [1, 1]} : vector<16x128xf32> to vector<16x32xf32>
    %56 = math.tanh %55 : vector<16x32xf32>
    %57 = arith.mulf %53, %37 : vector<16x32xf32>
    %58 = arith.mulf %52, %56 : vector<16x32xf32>
    %59 = arith.addf %57, %58 : vector<16x32xf32>
    %60 = math.tanh %59 : vector<16x32xf32>
    %61 = arith.mulf %54, %60 : vector<16x32xf32>
    %c0_26 = arith.constant 0 : index
    %c0_27 = arith.constant 0 : index
    %62 = vector.load %arg9[%c0_26, %c0_27] : memref<16x32xf32, #tpu.memory_space<vmem>>, vector<16x32xf32>
    tpu.vector_store %arg9[%c0_26, %c0_27], %61 {strides = array<i32>} : memref<16x32xf32, #tpu.memory_space<vmem>>, vector<16x32xf32>,
    %c0_28 = arith.constant 0 : index
    %c0_29 = arith.constant 0 : index
    %63 = vector.load %arg10[%c0_28, %c0_29] : memref<16x32xf32, #tpu.memory_space<vmem>>, vector<16x32xf32>
    tpu.vector_store %arg10[%c0_28, %c0_29], %59 {strides = array<i32>} : memref<16x32xf32, #tpu.memory_space<vmem>>, vector<16x32xf32>,
    %64 = arith.truncf %61 : vector<16x32xf32> to vector<16x32xbf16>
    %65 = arith.index_cast %c1_i32 : i32 to index
    %c0_30 = arith.constant 0 : index
    %c0_31 = arith.constant 0 : index
    %66 = vector.load %arg6[%65, %c0_30, %c0_31] : memref<8x16x32xbf16, #tpu.memory_space<vmem>>, vector<1x16x32xbf16>
    %67 = vector.shape_cast %66 : vector<1x16x32xbf16> to vector<16x32xbf16>
    %68 = vector.shape_cast %64 : vector<16x32xbf16> to vector<1x16x32xbf16>
    tpu.vector_store %arg6[%65, %c0_30, %c0_31], %68 {strides = array<i32>} : memref<8x16x32xbf16, #tpu.memory_space<vmem>>, vector<1x16x32xbf16>,
    %c2_i32 = arith.constant 2 : i32
    %c0_32 = arith.constant 0 : index
    %c0_33 = arith.constant 0 : index
    %69 = vector.load %arg9[%c0_32, %c0_33] : memref<16x32xf32, #tpu.memory_space<vmem>>, vector<16x32xf32>
    %c0_34 = arith.constant 0 : index
    %c0_35 = arith.constant 0 : index
    %70 = vector.load %arg10[%c0_34, %c0_35] : memref<16x32xf32, #tpu.memory_space<vmem>>, vector<16x32xf32>
    %71 = arith.index_cast %c2_i32 : i32 to index
    %c0_36 = arith.constant 0 : index
    %c0_37 = arith.constant 0 : index
    %72 = vector.load %arg2[%71, %c0_36, %c0_37] : memref<8x16x128xbf16, #tpu.memory_space<vmem>>, vector<1x16x128xbf16>
    %73 = vector.shape_cast %72 : vector<1x16x128xbf16> to vector<16x128xbf16>
    %74 = arith.truncf %69 : vector<16x32xf32> to vector<16x32xbf16>
    %c0_38 = arith.constant 0 : index
    %c0_39 = arith.constant 0 : index
    %75 = vector.load %arg3[%c0_38, %c0_39] : memref<32x128xbf16, #tpu.memory_space<vmem>>, vector<32x128xbf16>
    %cst_40 = arith.constant dense<0.000000e+00> : vector<16x128xf32>
    %76 = tpu.matmul %74, %75, %cst_40 {dimension_numbers = #tpu.dot_dimension_numbers<[1], [0], [0], [1], [0, 0, 1, 1], [], []>} : vector<16x32xbf16>, vector<32x128xbf16>, vector<16x128xf32> -> vector<16x128xf32>
    %77 = arith.extf %73 : vector<16x128xbf16> to vector<16x128xf32>
    %78 = arith.addf %77, %76 : vector<16x128xf32>
    %79 = vector.extract_strided_slice %78 {offsets = [0, 0], sizes = [16, 96], strides = [1, 1]} : vector<16x128xf32> to vector<16x96xf32>
    %80 = arith.negf %79 : vector<16x96xf32>
    %81 = math.exp %80 : vector<16x96xf32>
    %cst_41 = arith.constant 1.000000e+00 : f32
    %82 = vector.broadcast %cst_41 : f32 to vector<16x96xf32>
    %83 = arith.addf %82, %81 : vector<16x96xf32>
    %84 = arith.divf %82, %83 : vector<16x96xf32>
    %85 = vector.extract_strided_slice %84 {offsets = [0, 0], sizes = [16, 32], strides = [1, 1]} : vector<16x96xf32> to vector<16x32xf32>
    %86 = vector.extract_strided_slice %84 {offsets = [0, 32], sizes = [16, 32], strides = [1, 1]} : vector<16x96xf32> to vector<16x32xf32>
    %87 = vector.extract_strided_slice %84 {offsets = [0, 64], sizes = [16, 32], strides = [1, 1]} : vector<16x96xf32> to vector<16x32xf32>
    %88 = vector.extract_strided_slice %78 {offsets = [0, 96], sizes = [16, 32], strides = [1, 1]} : vector<16x128xf32> to vector<16x32xf32>
    %89 = math.tanh %88 : vector<16x32xf32>
    %90 = arith.mulf %86, %70 : vector<16x32xf32>
    %91 = arith.mulf %85, %89 : vector<16x32xf32>
    %92 = arith.addf %90, %91 : vector<16x32xf32>
    %93 = math.tanh %92 : vector<16x32xf32>
    %94 = arith.mulf %87, %93 : vector<16x32xf32>
    %c0_42 = arith.constant 0 : index
    %c0_43 = arith.constant 0 : index
    %95 = vector.load %arg9[%c0_42, %c0_43] : memref<16x32xf32, #tpu.memory_space<vmem>>, vector<16x32xf32>
    tpu.vector_store %arg9[%c0_42, %c0_43], %94 {strides = array<i32>} : memref<16x32xf32, #tpu.memory_space<vmem>>, vector<16x32xf32>,
    %c0_44 = arith.constant 0 : index
    %c0_45 = arith.constant 0 : index
    %96 = vector.load %arg10[%c0_44, %c0_45] : memref<16x32xf32, #tpu.memory_space<vmem>>, vector<16x32xf32>
    tpu.vector_store %arg10[%c0_44, %c0_45], %92 {strides = array<i32>} : memref<16x32xf32, #tpu.memory_space<vmem>>, vector<16x32xf32>,
    %97 = arith.truncf %94 : vector<16x32xf32> to vector<16x32xbf16>
    %98 = arith.index_cast %c2_i32 : i32 to index
    %c0_46 = arith.constant 0 : index
    %c0_47 = arith.constant 0 : index
    %99 = vector.load %arg6[%98, %c0_46, %c0_47] : memref<8x16x32xbf16, #tpu.memory_space<vmem>>, vector<1x16x32xbf16>
    %100 = vector.shape_cast %99 : vector<1x16x32xbf16> to vector<16x32xbf16>
    %101 = vector.shape_cast %97 : vector<16x32xbf16> to vector<1x16x32xbf16>
    tpu.vector_store %arg6[%98, %c0_46, %c0_47], %101 {strides = array<i32>} : memref<8x16x32xbf16, #tpu.memory_space<vmem>>, vector<1x16x32xbf16>,
    %c3_i32 = arith.constant 3 : i32
    %c0_48 = arith.constant 0 : index
    %c0_49 = arith.constant 0 : index
    %102 = vector.load %arg9[%c0_48, %c0_49] : memref<16x32xf32, #tpu.memory_space<vmem>>, vector<16x32xf32>
    %c0_50 = arith.constant 0 : index
    %c0_51 = arith.constant 0 : index
    %103 = vector.load %arg10[%c0_50, %c0_51] : memref<16x32xf32, #tpu.memory_space<vmem>>, vector<16x32xf32>
    %104 = arith.index_cast %c3_i32 : i32 to index
    %c0_52 = arith.constant 0 : index
    %c0_53 = arith.constant 0 : index
    %105 = vector.load %arg2[%104, %c0_52, %c0_53] : memref<8x16x128xbf16, #tpu.memory_space<vmem>>, vector<1x16x128xbf16>
    %106 = vector.shape_cast %105 : vector<1x16x128xbf16> to vector<16x128xbf16>
    %107 = arith.truncf %102 : vector<16x32xf32> to vector<16x32xbf16>
    %c0_54 = arith.constant 0 : index
    %c0_55 = arith.constant 0 : index
    %108 = vector.load %arg3[%c0_54, %c0_55] : memref<32x128xbf16, #tpu.memory_space<vmem>>, vector<32x128xbf16>
    %cst_56 = arith.constant dense<0.000000e+00> : vector<16x128xf32>
    %109 = tpu.matmul %107, %108, %cst_56 {dimension_numbers = #tpu.dot_dimension_numbers<[1], [0], [0], [1], [0, 0, 1, 1], [], []>} : vector<16x32xbf16>, vector<32x128xbf16>, vector<16x128xf32> -> vector<16x128xf32>
    %110 = arith.extf %106 : vector<16x128xbf16> to vector<16x128xf32>
    %111 = arith.addf %110, %109 : vector<16x128xf32>
    %112 = vector.extract_strided_slice %111 {offsets = [0, 0], sizes = [16, 96], strides = [1, 1]} : vector<16x128xf32> to vector<16x96xf32>
    %113 = arith.negf %112 : vector<16x96xf32>
    %114 = math.exp %113 : vector<16x96xf32>
    %cst_57 = arith.constant 1.000000e+00 : f32
    %115 = vector.broadcast %cst_57 : f32 to vector<16x96xf32>
    %116 = arith.addf %115, %114 : vector<16x96xf32>
    %117 = arith.divf %115, %116 : vector<16x96xf32>
    %118 = vector.extract_strided_slice %117 {offsets = [0, 0], sizes = [16, 32], strides = [1, 1]} : vector<16x96xf32> to vector<16x32xf32>
    %119 = vector.extract_strided_slice %117 {offsets = [0, 32], sizes = [16, 32], strides = [1, 1]} : vector<16x96xf32> to vector<16x32xf32>
    %120 = vector.extract_strided_slice %117 {offsets = [0, 64], sizes = [16, 32], strides = [1, 1]} : vector<16x96xf32> to vector<16x32xf32>
    %121 = vector.extract_strided_slice %111 {offsets = [0, 96], sizes = [16, 32], strides = [1, 1]} : vector<16x128xf32> to vector<16x32xf32>
    %122 = math.tanh %121 : vector<16x32xf32>
    %123 = arith.mulf %119, %103 : vector<16x32xf32>
    %124 = arith.mulf %118, %122 : vector<16x32xf32>
    %125 = arith.addf %123, %124 : vector<16x32xf32>
    %126 = math.tanh %125 : vector<16x32xf32>
    %127 = arith.mulf %120, %126 : vector<16x32xf32>
    %c0_58 = arith.constant 0 : index
    %c0_59 = arith.constant 0 : index
    %128 = vector.load %arg9[%c0_58, %c0_59] : memref<16x32xf32, #tpu.memory_space<vmem>>, vector<16x32xf32>
    tpu.vector_store %arg9[%c0_58, %c0_59], %127 {strides = array<i32>} : memref<16x32xf32, #tpu.memory_space<vmem>>, vector<16x32xf32>,
    %c0_60 = arith.constant 0 : index
    %c0_61 = arith.constant 0 : index
    %129 = vector.load %arg10[%c0_60, %c0_61] : memref<16x32xf32, #tpu.memory_space<vmem>>, vector<16x32xf32>
    tpu.vector_store %arg10[%c0_60, %c0_61], %125 {strides = array<i32>} : memref<16x32xf32, #tpu.memory_space<vmem>>, vector<16x32xf32>,
    %130 = arith.truncf %127 : vector<16x32xf32> to vector<16x32xbf16>
    %131 = arith.index_cast %c3_i32 : i32 to index
    %c0_62 = arith.constant 0 : index
    %c0_63 = arith.constant 0 : index
    %132 = vector.load %arg6[%131, %c0_62, %c0_63] : memref<8x16x32xbf16, #tpu.memory_space<vmem>>, vector<1x16x32xbf16>
    %133 = vector.shape_cast %132 : vector<1x16x32xbf16> to vector<16x32xbf16>
    %134 = vector.shape_cast %130 : vector<16x32xbf16> to vector<1x16x32xbf16>
    tpu.vector_store %arg6[%131, %c0_62, %c0_63], %134 {strides = array<i32>} : memref<8x16x32xbf16, #tpu.memory_space<vmem>>, vector<1x16x32xbf16>,
    %c4_i32 = arith.constant 4 : i32
    %c0_64 = arith.constant 0 : index
    %c0_65 = arith.constant 0 : index
    %135 = vector.load %arg9[%c0_64, %c0_65] : memref<16x32xf32, #tpu.memory_space<vmem>>, vector<16x32xf32>
    %c0_66 = arith.constant 0 : index
    %c0_67 = arith.constant 0 : index
    %136 = vector.load %arg10[%c0_66, %c0_67] : memref<16x32xf32, #tpu.memory_space<vmem>>, vector<16x32xf32>
    %137 = arith.index_cast %c4_i32 : i32 to index
    %c0_68 = arith.constant 0 : index
    %c0_69 = arith.constant 0 : index
    %138 = vector.load %arg2[%137, %c0_68, %c0_69] : memref<8x16x128xbf16, #tpu.memory_space<vmem>>, vector<1x16x128xbf16>
    %139 = vector.shape_cast %138 : vector<1x16x128xbf16> to vector<16x128xbf16>
    %140 = arith.truncf %135 : vector<16x32xf32> to vector<16x32xbf16>
    %c0_70 = arith.constant 0 : index
    %c0_71 = arith.constant 0 : index
    %141 = vector.load %arg3[%c0_70, %c0_71] : memref<32x128xbf16, #tpu.memory_space<vmem>>, vector<32x128xbf16>
    %cst_72 = arith.constant dense<0.000000e+00> : vector<16x128xf32>
    %142 = tpu.matmul %140, %141, %cst_72 {dimension_numbers = #tpu.dot_dimension_numbers<[1], [0], [0], [1], [0, 0, 1, 1], [], []>} : vector<16x32xbf16>, vector<32x128xbf16>, vector<16x128xf32> -> vector<16x128xf32>
    %143 = arith.extf %139 : vector<16x128xbf16> to vector<16x128xf32>
    %144 = arith.addf %143, %142 : vector<16x128xf32>
    %145 = vector.extract_strided_slice %144 {offsets = [0, 0], sizes = [16, 96], strides = [1, 1]} : vector<16x128xf32> to vector<16x96xf32>
    %146 = arith.negf %145 : vector<16x96xf32>
    %147 = math.exp %146 : vector<16x96xf32>
    %cst_73 = arith.constant 1.000000e+00 : f32
    %148 = vector.broadcast %cst_73 : f32 to vector<16x96xf32>
    %149 = arith.addf %148, %147 : vector<16x96xf32>
    %150 = arith.divf %148, %149 : vector<16x96xf32>
    %151 = vector.extract_strided_slice %150 {offsets = [0, 0], sizes = [16, 32], strides = [1, 1]} : vector<16x96xf32> to vector<16x32xf32>
    %152 = vector.extract_strided_slice %150 {offsets = [0, 32], sizes = [16, 32], strides = [1, 1]} : vector<16x96xf32> to vector<16x32xf32>
    %153 = vector.extract_strided_slice %150 {offsets = [0, 64], sizes = [16, 32], strides = [1, 1]} : vector<16x96xf32> to vector<16x32xf32>
    %154 = vector.extract_strided_slice %144 {offsets = [0, 96], sizes = [16, 32], strides = [1, 1]} : vector<16x128xf32> to vector<16x32xf32>
    %155 = math.tanh %154 : vector<16x32xf32>
    %156 = arith.mulf %152, %136 : vector<16x32xf32>
    %157 = arith.mulf %151, %155 : vector<16x32xf32>
    %158 = arith.addf %156, %157 : vector<16x32xf32>
    %159 = math.tanh %158 : vector<16x32xf32>
    %160 = arith.mulf %153, %159 : vector<16x32xf32>
    %c0_74 = arith.constant 0 : index
    %c0_75 = arith.constant 0 : index
    %161 = vector.load %arg9[%c0_74, %c0_75] : memref<16x32xf32, #tpu.memory_space<vmem>>, vector<16x32xf32>
    tpu.vector_store %arg9[%c0_74, %c0_75], %160 {strides = array<i32>} : memref<16x32xf32, #tpu.memory_space<vmem>>, vector<16x32xf32>,
    %c0_76 = arith.constant 0 : index
    %c0_77 = arith.constant 0 : index
    %162 = vector.load %arg10[%c0_76, %c0_77] : memref<16x32xf32, #tpu.memory_space<vmem>>, vector<16x32xf32>
    tpu.vector_store %arg10[%c0_76, %c0_77], %158 {strides = array<i32>} : memref<16x32xf32, #tpu.memory_space<vmem>>, vector<16x32xf32>,
    %163 = arith.truncf %160 : vector<16x32xf32> to vector<16x32xbf16>
    %164 = arith.index_cast %c4_i32 : i32 to index
    %c0_78 = arith.constant 0 : index
    %c0_79 = arith.constant 0 : index
    %165 = vector.load %arg6[%164, %c0_78, %c0_79] : memref<8x16x32xbf16, #tpu.memory_space<vmem>>, vector<1x16x32xbf16>
    %166 = vector.shape_cast %165 : vector<1x16x32xbf16> to vector<16x32xbf16>
    %167 = vector.shape_cast %163 : vector<16x32xbf16> to vector<1x16x32xbf16>
    tpu.vector_store %arg6[%164, %c0_78, %c0_79], %167 {strides = array<i32>} : memref<8x16x32xbf16, #tpu.memory_space<vmem>>, vector<1x16x32xbf16>,
    %c5_i32 = arith.constant 5 : i32
    %c0_80 = arith.constant 0 : index
    %c0_81 = arith.constant 0 : index
    %168 = vector.load %arg9[%c0_80, %c0_81] : memref<16x32xf32, #tpu.memory_space<vmem>>, vector<16x32xf32>
    %c0_82 = arith.constant 0 : index
    %c0_83 = arith.constant 0 : index
    %169 = vector.load %arg10[%c0_82, %c0_83] : memref<16x32xf32, #tpu.memory_space<vmem>>, vector<16x32xf32>
    %170 = arith.index_cast %c5_i32 : i32 to index
    %c0_84 = arith.constant 0 : index
    %c0_85 = arith.constant 0 : index
    %171 = vector.load %arg2[%170, %c0_84, %c0_85] : memref<8x16x128xbf16, #tpu.memory_space<vmem>>, vector<1x16x128xbf16>
    %172 = vector.shape_cast %171 : vector<1x16x128xbf16> to vector<16x128xbf16>
    %173 = arith.truncf %168 : vector<16x32xf32> to vector<16x32xbf16>
    %c0_86 = arith.constant 0 : index
    %c0_87 = arith.constant 0 : index
    %174 = vector.load %arg3[%c0_86, %c0_87] : memref<32x128xbf16, #tpu.memory_space<vmem>>, vector<32x128xbf16>
    %cst_88 = arith.constant dense<0.000000e+00> : vector<16x128xf32>
    %175 = tpu.matmul %173, %174, %cst_88 {dimension_numbers = #tpu.dot_dimension_numbers<[1], [0], [0], [1], [0, 0, 1, 1], [], []>} : vector<16x32xbf16>, vector<32x128xbf16>, vector<16x128xf32> -> vector<16x128xf32>
    %176 = arith.extf %172 : vector<16x128xbf16> to vector<16x128xf32>
    %177 = arith.addf %176, %175 : vector<16x128xf32>
    %178 = vector.extract_strided_slice %177 {offsets = [0, 0], sizes = [16, 96], strides = [1, 1]} : vector<16x128xf32> to vector<16x96xf32>
    %179 = arith.negf %178 : vector<16x96xf32>
    %180 = math.exp %179 : vector<16x96xf32>
    %cst_89 = arith.constant 1.000000e+00 : f32
    %181 = vector.broadcast %cst_89 : f32 to vector<16x96xf32>
    %182 = arith.addf %181, %180 : vector<16x96xf32>
    %183 = arith.divf %181, %182 : vector<16x96xf32>
    %184 = vector.extract_strided_slice %183 {offsets = [0, 0], sizes = [16, 32], strides = [1, 1]} : vector<16x96xf32> to vector<16x32xf32>
    %185 = vector.extract_strided_slice %183 {offsets = [0, 32], sizes = [16, 32], strides = [1, 1]} : vector<16x96xf32> to vector<16x32xf32>
    %186 = vector.extract_strided_slice %183 {offsets = [0, 64], sizes = [16, 32], strides = [1, 1]} : vector<16x96xf32> to vector<16x32xf32>
    %187 = vector.extract_strided_slice %177 {offsets = [0, 96], sizes = [16, 32], strides = [1, 1]} : vector<16x128xf32> to vector<16x32xf32>
    %188 = math.tanh %187 : vector<16x32xf32>
    %189 = arith.mulf %185, %169 : vector<16x32xf32>
    %190 = arith.mulf %184, %188 : vector<16x32xf32>
    %191 = arith.addf %189, %190 : vector<16x32xf32>
    %192 = math.tanh %191 : vector<16x32xf32>
    %193 = arith.mulf %186, %192 : vector<16x32xf32>
    %c0_90 = arith.constant 0 : index
    %c0_91 = arith.constant 0 : index
    %194 = vector.load %arg9[%c0_90, %c0_91] : memref<16x32xf32, #tpu.memory_space<vmem>>, vector<16x32xf32>
    tpu.vector_store %arg9[%c0_90, %c0_91], %193 {strides = array<i32>} : memref<16x32xf32, #tpu.memory_space<vmem>>, vector<16x32xf32>,
    %c0_92 = arith.constant 0 : index
    %c0_93 = arith.constant 0 : index
    %195 = vector.load %arg10[%c0_92, %c0_93] : memref<16x32xf32, #tpu.memory_space<vmem>>, vector<16x32xf32>
    tpu.vector_store %arg10[%c0_92, %c0_93], %191 {strides = array<i32>} : memref<16x32xf32, #tpu.memory_space<vmem>>, vector<16x32xf32>,
    %196 = arith.truncf %193 : vector<16x32xf32> to vector<16x32xbf16>
    %197 = arith.index_cast %c5_i32 : i32 to index
    %c0_94 = arith.constant 0 : index
    %c0_95 = arith.constant 0 : index
    %198 = vector.load %arg6[%197, %c0_94, %c0_95] : memref<8x16x32xbf16, #tpu.memory_space<vmem>>, vector<1x16x32xbf16>
    %199 = vector.shape_cast %198 : vector<1x16x32xbf16> to vector<16x32xbf16>
    %200 = vector.shape_cast %196 : vector<16x32xbf16> to vector<1x16x32xbf16>
    tpu.vector_store %arg6[%197, %c0_94, %c0_95], %200 {strides = array<i32>} : memref<8x16x32xbf16, #tpu.memory_space<vmem>>, vector<1x16x32xbf16>,
    %c6_i32 = arith.constant 6 : i32
    %c0_96 = arith.constant 0 : index
    %c0_97 = arith.constant 0 : index
    %201 = vector.load %arg9[%c0_96, %c0_97] : memref<16x32xf32, #tpu.memory_space<vmem>>, vector<16x32xf32>
    %c0_98 = arith.constant 0 : index
    %c0_99 = arith.constant 0 : index
    %202 = vector.load %arg10[%c0_98, %c0_99] : memref<16x32xf32, #tpu.memory_space<vmem>>, vector<16x32xf32>
    %203 = arith.index_cast %c6_i32 : i32 to index
    %c0_100 = arith.constant 0 : index
    %c0_101 = arith.constant 0 : index
    %204 = vector.load %arg2[%203, %c0_100, %c0_101] : memref<8x16x128xbf16, #tpu.memory_space<vmem>>, vector<1x16x128xbf16>
    %205 = vector.shape_cast %204 : vector<1x16x128xbf16> to vector<16x128xbf16>
    %206 = arith.truncf %201 : vector<16x32xf32> to vector<16x32xbf16>
    %c0_102 = arith.constant 0 : index
    %c0_103 = arith.constant 0 : index
    %207 = vector.load %arg3[%c0_102, %c0_103] : memref<32x128xbf16, #tpu.memory_space<vmem>>, vector<32x128xbf16>
    %cst_104 = arith.constant dense<0.000000e+00> : vector<16x128xf32>
    %208 = tpu.matmul %206, %207, %cst_104 {dimension_numbers = #tpu.dot_dimension_numbers<[1], [0], [0], [1], [0, 0, 1, 1], [], []>} : vector<16x32xbf16>, vector<32x128xbf16>, vector<16x128xf32> -> vector<16x128xf32>
    %209 = arith.extf %205 : vector<16x128xbf16> to vector<16x128xf32>
    %210 = arith.addf %209, %208 : vector<16x128xf32>
    %211 = vector.extract_strided_slice %210 {offsets = [0, 0], sizes = [16, 96], strides = [1, 1]} : vector<16x128xf32> to vector<16x96xf32>
    %212 = arith.negf %211 : vector<16x96xf32>
    %213 = math.exp %212 : vector<16x96xf32>
    %cst_105 = arith.constant 1.000000e+00 : f32
    %214 = vector.broadcast %cst_105 : f32 to vector<16x96xf32>
    %215 = arith.addf %214, %213 : vector<16x96xf32>
    %216 = arith.divf %214, %215 : vector<16x96xf32>
    %217 = vector.extract_strided_slice %216 {offsets = [0, 0], sizes = [16, 32], strides = [1, 1]} : vector<16x96xf32> to vector<16x32xf32>
    %218 = vector.extract_strided_slice %216 {offsets = [0, 32], sizes = [16, 32], strides = [1, 1]} : vector<16x96xf32> to vector<16x32xf32>
    %219 = vector.extract_strided_slice %216 {offsets = [0, 64], sizes = [16, 32], strides = [1, 1]} : vector<16x96xf32> to vector<16x32xf32>
    %220 = vector.extract_strided_slice %210 {offsets = [0, 96], sizes = [16, 32], strides = [1, 1]} : vector<16x128xf32> to vector<16x32xf32>
    %221 = math.tanh %220 : vector<16x32xf32>
    %222 = arith.mulf %218, %202 : vector<16x32xf32>
    %223 = arith.mulf %217, %221 : vector<16x32xf32>
    %224 = arith.addf %222, %223 : vector<16x32xf32>
    %225 = math.tanh %224 : vector<16x32xf32>
    %226 = arith.mulf %219, %225 : vector<16x32xf32>
    %c0_106 = arith.constant 0 : index
    %c0_107 = arith.constant 0 : index
    %227 = vector.load %arg9[%c0_106, %c0_107] : memref<16x32xf32, #tpu.memory_space<vmem>>, vector<16x32xf32>
    tpu.vector_store %arg9[%c0_106, %c0_107], %226 {strides = array<i32>} : memref<16x32xf32, #tpu.memory_space<vmem>>, vector<16x32xf32>,
    %c0_108 = arith.constant 0 : index
    %c0_109 = arith.constant 0 : index
    %228 = vector.load %arg10[%c0_108, %c0_109] : memref<16x32xf32, #tpu.memory_space<vmem>>, vector<16x32xf32>
    tpu.vector_store %arg10[%c0_108, %c0_109], %224 {strides = array<i32>} : memref<16x32xf32, #tpu.memory_space<vmem>>, vector<16x32xf32>,
    %229 = arith.truncf %226 : vector<16x32xf32> to vector<16x32xbf16>
    %230 = arith.index_cast %c6_i32 : i32 to index
    %c0_110 = arith.constant 0 : index
    %c0_111 = arith.constant 0 : index
    %231 = vector.load %arg6[%230, %c0_110, %c0_111] : memref<8x16x32xbf16, #tpu.memory_space<vmem>>, vector<1x16x32xbf16>
    %232 = vector.shape_cast %231 : vector<1x16x32xbf16> to vector<16x32xbf16>
    %233 = vector.shape_cast %229 : vector<16x32xbf16> to vector<1x16x32xbf16>
    tpu.vector_store %arg6[%230, %c0_110, %c0_111], %233 {strides = array<i32>} : memref<8x16x32xbf16, #tpu.memory_space<vmem>>, vector<1x16x32xbf16>,
    %c7_i32 = arith.constant 7 : i32
    %c0_112 = arith.constant 0 : index
    %c0_113 = arith.constant 0 : index
    %234 = vector.load %arg9[%c0_112, %c0_113] : memref<16x32xf32, #tpu.memory_space<vmem>>, vector<16x32xf32>
    %c0_114 = arith.constant 0 : index
    %c0_115 = arith.constant 0 : index
    %235 = vector.load %arg10[%c0_114, %c0_115] : memref<16x32xf32, #tpu.memory_space<vmem>>, vector<16x32xf32>
    %236 = arith.index_cast %c7_i32 : i32 to index
    %c0_116 = arith.constant 0 : index
    %c0_117 = arith.constant 0 : index
    %237 = vector.load %arg2[%236, %c0_116, %c0_117] : memref<8x16x128xbf16, #tpu.memory_space<vmem>>, vector<1x16x128xbf16>
    %238 = vector.shape_cast %237 : vector<1x16x128xbf16> to vector<16x128xbf16>
    %239 = arith.truncf %234 : vector<16x32xf32> to vector<16x32xbf16>
    %c0_118 = arith.constant 0 : index
    %c0_119 = arith.constant 0 : index
    %240 = vector.load %arg3[%c0_118, %c0_119] : memref<32x128xbf16, #tpu.memory_space<vmem>>, vector<32x128xbf16>
    %cst_120 = arith.constant dense<0.000000e+00> : vector<16x128xf32>
    %241 = tpu.matmul %239, %240, %cst_120 {dimension_numbers = #tpu.dot_dimension_numbers<[1], [0], [0], [1], [0, 0, 1, 1], [], []>} : vector<16x32xbf16>, vector<32x128xbf16>, vector<16x128xf32> -> vector<16x128xf32>
    %242 = arith.extf %238 : vector<16x128xbf16> to vector<16x128xf32>
    %243 = arith.addf %242, %241 : vector<16x128xf32>
    %244 = vector.extract_strided_slice %243 {offsets = [0, 0], sizes = [16, 96], strides = [1, 1]} : vector<16x128xf32> to vector<16x96xf32>
    %245 = arith.negf %244 : vector<16x96xf32>
    %246 = math.exp %245 : vector<16x96xf32>
    %cst_121 = arith.constant 1.000000e+00 : f32
    %247 = vector.broadcast %cst_121 : f32 to vector<16x96xf32>
    %248 = arith.addf %247, %246 : vector<16x96xf32>
    %249 = arith.divf %247, %248 : vector<16x96xf32>
    %250 = vector.extract_strided_slice %249 {offsets = [0, 0], sizes = [16, 32], strides = [1, 1]} : vector<16x96xf32> to vector<16x32xf32>
    %251 = vector.extract_strided_slice %249 {offsets = [0, 32], sizes = [16, 32], strides = [1, 1]} : vector<16x96xf32> to vector<16x32xf32>
    %252 = vector.extract_strided_slice %249 {offsets = [0, 64], sizes = [16, 32], strides = [1, 1]} : vector<16x96xf32> to vector<16x32xf32>
    %253 = vector.extract_strided_slice %243 {offsets = [0, 96], sizes = [16, 32], strides = [1, 1]} : vector<16x128xf32> to vector<16x32xf32>
    %254 = math.tanh %253 : vector<16x32xf32>
    %255 = arith.mulf %251, %235 : vector<16x32xf32>
    %256 = arith.mulf %250, %254 : vector<16x32xf32>
    %257 = arith.addf %255, %256 : vector<16x32xf32>
    %258 = math.tanh %257 : vector<16x32xf32>
    %259 = arith.mulf %252, %258 : vector<16x32xf32>
    %c0_122 = arith.constant 0 : index
    %c0_123 = arith.constant 0 : index
    %260 = vector.load %arg9[%c0_122, %c0_123] : memref<16x32xf32, #tpu.memory_space<vmem>>, vector<16x32xf32>
    tpu.vector_store %arg9[%c0_122, %c0_123], %259 {strides = array<i32>} : memref<16x32xf32, #tpu.memory_space<vmem>>, vector<16x32xf32>,
    %c0_124 = arith.constant 0 : index
    %c0_125 = arith.constant 0 : index
    %261 = vector.load %arg10[%c0_124, %c0_125] : memref<16x32xf32, #tpu.memory_space<vmem>>, vector<16x32xf32>
    tpu.vector_store %arg10[%c0_124, %c0_125], %257 {strides = array<i32>} : memref<16x32xf32, #tpu.memory_space<vmem>>, vector<16x32xf32>,
    %262 = arith.truncf %259 : vector<16x32xf32> to vector<16x32xbf16>
    %263 = arith.index_cast %c7_i32 : i32 to index
    %c0_126 = arith.constant 0 : index
    %c0_127 = arith.constant 0 : index
    %264 = vector.load %arg6[%263, %c0_126, %c0_127] : memref<8x16x32xbf16, #tpu.memory_space<vmem>>, vector<1x16x32xbf16>
    %265 = vector.shape_cast %264 : vector<1x16x32xbf16> to vector<16x32xbf16>
    %266 = vector.shape_cast %262 : vector<16x32xbf16> to vector<1x16x32xbf16>
    tpu.vector_store %arg6[%263, %c0_126, %c0_127], %266 {strides = array<i32>} : memref<8x16x32xbf16, #tpu.memory_space<vmem>>, vector<1x16x32xbf16>,
    %c8_i32 = arith.constant 8 : i32
    %c0_i32_128 = arith.constant 0 : i32
    %267 = arith.cmpi eq, %arg1, %c0_i32_128 : i32
    %268 = arith.extui %267 : i1 to i32
    %c0_i32_129 = arith.constant 0 : i32
    %269 = arith.cmpi ne, %268, %c0_i32_129 : i32
    scf.if %269 {
      %c0_130 = arith.constant 0 : index
      %c0_131 = arith.constant 0 : index
      %270 = vector.load %arg9[%c0_130, %c0_131] : memref<16x32xf32, #tpu.memory_space<vmem>>, vector<16x32xf32>
      %c0_132 = arith.constant 0 : index
      %c0_133 = arith.constant 0 : index
      %271 = vector.load %arg7[%c0_132, %c0_133] : memref<16x32xf32, #tpu.memory_space<vmem>>, vector<16x32xf32>
      tpu.vector_store %arg7[%c0_132, %c0_133], %270 {strides = array<i32>} : memref<16x32xf32, #tpu.memory_space<vmem>>, vector<16x32xf32>,
      %c0_134 = arith.constant 0 : index
      %c0_135 = arith.constant 0 : index
      %272 = vector.load %arg10[%c0_134, %c0_135] : memref<16x32xf32, #tpu.memory_space<vmem>>, vector<16x32xf32>
      %c0_136 = arith.constant 0 : index
      %c0_137 = arith.constant 0 : index
      %273 = vector.load %arg8[%c0_136, %c0_137] : memref<16x32xf32, #tpu.memory_space<vmem>>, vector<16x32xf32>
      tpu.vector_store %arg8[%c0_136, %c0_137], %272 {strides = array<i32>} : memref<16x32xf32, #tpu.memory_space<vmem>>, vector<16x32xf32>,
    } else {
    }
    return
  }
  func.func @transform_0(%arg0: i32, %arg1: i32) -> (i32, i32, i32) {
    %c0_i32 = arith.constant 0 : i32
    %c0_i32_0 = arith.constant 0 : i32
    return %arg1, %arg0, %c0_i32 : i32, i32, i32
  }
  func.func @transform_1(%arg0: i32, %arg1: i32) -> (i32, i32) {
    %c0_i32 = arith.constant 0 : i32
    %c0_i32_0 = arith.constant 0 : i32
    %c0_i32_1 = arith.constant 0 : i32
    return %c0_i32, %c0_i32_0 : i32, i32
  }
  func.func @transform_2(%arg0: i32, %arg1: i32) -> (i32, i32) {
    %c0_i32 = arith.constant 0 : i32
    %c0_i32_0 = arith.constant 0 : i32
    return %arg0, %c0_i32 : i32, i32
  }
  func.func @transform_3(%arg0: i32, %arg1: i32) -> (i32, i32) {
    %c0_i32 = arith.constant 0 : i32
    %c0_i32_0 = arith.constant 0 : i32
    return %arg0, %c0_i32 : i32, i32
  }
  func.func @transform_4(%arg0: i32, %arg1: i32) -> (i32, i32, i32) {
    %c0_i32 = arith.constant 0 : i32
    %c0_i32_0 = arith.constant 0 : i32
    return %arg1, %arg0, %c0_i32 : i32, i32, i32
  }
  func.func @transform_5(%arg0: i32, %arg1: i32) -> (i32, i32) {
    %c0_i32 = arith.constant 0 : i32
    %c0_i32_0 = arith.constant 0 : i32
    return %arg0, %c0_i32 : i32, i32
  }
  func.func @transform_6(%arg0: i32, %arg1: i32) -> (i32, i32) {
    %c0_i32 = arith.constant 0 : i32
    %c0_i32_0 = arith.constant 0 : i32
    return %arg0, %c0_i32 : i32, i32
  }
}

</mosaic_0001>

<bundles_post_ra>
// kernel: poetry_model_forward.5
= control target key start
LH: loop header
LB: loop body
LE: loop exit
PB: predicated region body
PF: predicated region fallthrough
CT: control target
= control target key end

     0   :  { %vm91_vm0 = vcmask 261120   ;;  %s398_s1 = inlined_call_operand.vmem [shape: bf16[32,128], index: 1, kind: input, shape index: {}]   ;;  %s399_s0 = inlined_call_operand.vmem [shape: bf16[128,32], index: 0, kind: input, shape index: {}]   ;;  %s400_s2 = inlined_call_operand.vmem [shape: f32[1,128], index: 2, kind: input, shape index: {}]   ;;  %s401_s3 = inlined_call_operand.vmem [shape: bf16[128,128], index: 3, kind: output, shape index: {}]  }
   0x1   :  { %v258_v0 = vld [vmem:[%s398_s1 + $0x8] sm:$0xff]  ;;  %v257_v1 = vld [vmem:[%s398_s1] sm:$0xff]  ;;  %v251_v3 = vld [vmem:[%s399_s0 + $0x10] sm:$0xff] }
   0x2   :  { %122 = vmatpush.bf16.msra.mxu0 %v258_v0  ;;  %306 = vmatpush.bf16.msra.mxu1 %v258_v0  ;;  %v249_v2 = vld [vmem:[%s399_s0] sm:$0xff]  ;;  %v255_v5 = vld [vmem:[%s399_s0 + $0x30] sm:$0xff]  ;;  %v250_v6 = vld [vmem:[%s399_s0 + $0x8] sm:$0xff] }
   0x3   :  { %307 = vmatpush.bf16.msra.mxu2 %v258_v0  ;;  %308 = vmatpush.bf16.msra.mxu3 %v258_v0  ;;  %v253_v4 = vld [vmem:[%s399_s0 + $0x20] sm:$0xff]  ;;  %v252_v7 = vld [vmem:[%s399_s0 + $0x18] sm:$0xff]  ;;  %v254_v8 = vld [vmem:[%s399_s0 + $0x28] sm:$0xff] }
   0x4   :  { %v256_v9 = vld [vmem:[%s399_s0 + $0x38] sm:$0xff]  ;;  %v312_v12 = vld [vmem:[%s400_s2] ss:$0 sm:$0xff] }
   0x6   :  { %123 = vmatpush.bf16.msra.mxu0 %v257_v1  ;;  %309 = vmatpush.bf16.msra.mxu1 %v257_v1 }
   0x7   :  { %310 = vmatpush.bf16.msra.mxu2 %v257_v1  ;;  %311 = vmatpush.bf16.msra.mxu3 %v257_v1 }
   0x9   :  { %241 = vmatmul.msk.bf16.vlgmr.msra.gmra.mxu0 %vm91_vm0, %v249_v2  ;;  %243 = vmatmul.msk.bf16.vlgmr.msra.gmra.mxu1 %vm91_vm0, %v251_v3 }
   0xa   :  { %245 = vmatmul.msk.bf16.vlgmr.msra.gmra.mxu2 %vm91_vm0, %v253_v4  ;;  %247 = vmatmul.msk.bf16.vlgmr.msra.gmra.mxu3 %vm91_vm0, %v255_v5 }
  0x19   :  { %242 = vmatmul.msk.bf16.gmra.mxu0 %vm91_vm0, %v250_v6  ;;  %244 = vmatmul.msk.bf16.gmra.mxu1 %vm91_vm0, %v252_v7 }
  0x1a   :  { %246 = vmatmul.msk.bf16.gmra.mxu2 %vm91_vm0, %v254_v8  ;;  %248 = vmatmul.msk.bf16.gmra.mxu3 %vm91_vm0, %v256_v9 }
  0x86   :  { %v125_v10 = vpop.f32.mrf.mxu0  ;;  %v135_v11 = vpop.f32.mrf.mxu1 }
  0x87   :  { %v126_v17 = vadd.f32 %v312_v12, %v125_v10  ;;  %v136_v18 = vadd.f32 %v312_v12, %v135_v11 }
  0x8d   :  { %v145_v13 = vpop.f32.mrf.mxu2  ;;  %v155_v14 = vpop.f32.mrf.mxu3 }
  0x8e   :  { %v127_v15 = vpop.f32.mrf.mxu0  ;;  %v137_v16 = vpop.f32.mrf.mxu1  ;;  %v146_v25 = vadd.f32 %v312_v12, %v145_v13  ;;  %v156_v26 = vadd.f32 %v312_v12, %v155_v14 }
  0x8f   :  { %v128_v19 = vadd.f32 %v312_v12, %v127_v15  ;;  %v138_v20 = vadd.f32 %v312_v12, %v137_v16 }
  0x91   :  { %v262_v21 = vpack.c.bf16 %v128_v19, %v126_v17  ;;  %v272_v22 = vpack.c.bf16 %v138_v20, %v136_v18 }
  0x93   :  { %263 = vst [vmem:[%s401_s3] sm:$0xff] %v262_v21  }
  0x94   :  { %300 = vst [vmem:[%s401_s3 + $0x10] sm:$0xff] %v272_v22  }
  0x95   :  { %v147_v23 = vpop.f32.mrf.mxu2  ;;  %v157_v24 = vpop.f32.mrf.mxu3 }
  0x96   :  { %v148_v27 = vadd.f32 %v312_v12, %v147_v23  ;;  %v158_v28 = vadd.f32 %v312_v12, %v157_v24  ;;  %v130_v29 = vpop.f32.mrf.mxu0  ;;  %v140_v30 = vpop.f32.mrf.mxu1 }
  0x97   :  { %v131_v37 = vadd.f32 %v312_v12, %v130_v29  ;;  %v141_v38 = vadd.f32 %v312_v12, %v140_v30 }
  0x98   :  { %v282_v31 = vpack.c.bf16 %v148_v27, %v146_v25  ;;  %v292_v32 = vpack.c.bf16 %v158_v28, %v156_v26 }
  0x9a   :  { %302 = vst [vmem:[%s401_s3 + $0x20] sm:$0xff] %v282_v31  }
  0x9b   :  { %304 = vst [vmem:[%s401_s3 + $0x30] sm:$0xff] %v292_v32  }
  0x9d   :  { %v150_v33 = vpop.f32.mrf.mxu2  ;;  %v160_v34 = vpop.f32.mrf.mxu3 }
  0x9e   :  { %v132_v35 = vpop.f32.mrf.mxu0  ;;  %v142_v36 = vpop.f32.mrf.mxu1  ;;  %v151_v45 = vadd.f32 %v312_v12, %v150_v33  ;;  %v161_v46 = vadd.f32 %v312_v12, %v160_v34 }
  0x9f   :  { %v133_v39 = vadd.f32 %v312_v12, %v132_v35  ;;  %v143_v40 = vadd.f32 %v312_v12, %v142_v36 }
  0xa1   :  { %v267_v41 = vpack.c.bf16 %v133_v39, %v131_v37  ;;  %v277_v42 = vpack.c.bf16 %v143_v40, %v141_v38 }
  0xa3   :  { %299 = vst [vmem:[%s401_s3 + $0x8] sm:$0xff] %v267_v41  }
  0xa4   :  { %301 = vst [vmem:[%s401_s3 + $0x18] sm:$0xff] %v277_v42  }
  0xa5   :  { %v152_v43 = vpop.f32.mrf.mxu2  ;;  %v162_v44 = vpop.f32.mrf.mxu3 }
  0xa6   :  { %v153_v47 = vadd.f32 %v312_v12, %v152_v43  ;;  %v163_v48 = vadd.f32 %v312_v12, %v162_v44 }
  0xa8   :  { %v287_v49 = vpack.c.bf16 %v153_v47, %v151_v45  ;;  %v297_v50 = vpack.c.bf16 %v163_v48, %v161_v46 }
  0xaa   :  { %303 = vst [vmem:[%s401_s3 + $0x28] sm:$0xff] %v287_v49  }
  0xab   :  { %305 = vst [vmem:[%s401_s3 + $0x38] sm:$0xff] %v297_v50  }

// kernel: poetry_model_forward.9
= control target key start
LH: loop header
LB: loop body
LE: loop exit
PB: predicated region body
PF: predicated region fallthrough
CT: control target
= control target key end

     0   :  { %vm91_vm0 = vcmask 261120   ;;  %s359_s1 = inlined_call_operand.vmem [shape: bf16[32,128], index: 1, kind: input, shape index: {}]   ;;  %s360_s0 = inlined_call_operand.vmem [shape: bf16[128,32], index: 0, kind: input, shape index: {}]   ;;  %s361_s2 = inlined_call_operand.vmem [shape: f32[1,128], index: 2, kind: input, shape index: {}]   ;;  %s362_s3 = inlined_call_operand.vmem [shape: f32[128,128], index: 3, kind: output, shape index: {}]  }
   0x1   :  { %v242_v0 = vld [vmem:[%s359_s1 + $0x8] sm:$0xff]  ;;  %v241_v1 = vld [vmem:[%s359_s1] sm:$0xff]  ;;  %v235_v3 = vld [vmem:[%s360_s0 + $0x10] sm:$0xff] }
   0x2   :  { %122 = vmatpush.bf16.msra.mxu0 %v242_v0  ;;  %243 = vmatpush.bf16.msra.mxu1 %v242_v0  ;;  %v233_v2 = vld [vmem:[%s360_s0] sm:$0xff]  ;;  %v239_v5 = vld [vmem:[%s360_s0 + $0x30] sm:$0xff]  ;;  %v234_v6 = vld [vmem:[%s360_s0 + $0x8] sm:$0xff] }
   0x3   :  { %244 = vmatpush.bf16.msra.mxu2 %v242_v0  ;;  %245 = vmatpush.bf16.msra.mxu3 %v242_v0  ;;  %v237_v4 = vld [vmem:[%s360_s0 + $0x20] sm:$0xff]  ;;  %v236_v7 = vld [vmem:[%s360_s0 + $0x18] sm:$0xff]  ;;  %v238_v8 = vld [vmem:[%s360_s0 + $0x28] sm:$0xff] }
   0x4   :  { %v240_v9 = vld [vmem:[%s360_s0 + $0x38] sm:$0xff]  ;;  %v249_v10 = vld [vmem:[%s361_s2] ss:$0 sm:$0xff] }
   0x6   :  { %123 = vmatpush.bf16.msra.mxu0 %v241_v1  ;;  %246 = vmatpush.bf16.msra.mxu1 %v241_v1 }
   0x7   :  { %247 = vmatpush.bf16.msra.mxu2 %v241_v1  ;;  %248 = vmatpush.bf16.msra.mxu3 %v241_v1 }
   0x9   :  { %225 = vmatmul.msk.bf16.vlgmr.msra.gmra.mxu0 %vm91_vm0, %v233_v2  ;;  %227 = vmatmul.msk.bf16.vlgmr.msra.gmra.mxu1 %vm91_vm0, %v235_v3 }
   0xa   :  { %229 = vmatmul.msk.bf16.vlgmr.msra.gmra.mxu2 %vm91_vm0, %v237_v4  ;;  %231 = vmatmul.msk.bf16.vlgmr.msra.gmra.mxu3 %vm91_vm0, %v239_v5 }
  0x19   :  { %226 = vmatmul.msk.bf16.gmra.mxu0 %vm91_vm0, %v234_v6  ;;  %228 = vmatmul.msk.bf16.gmra.mxu1 %vm91_vm0, %v236_v7 }
  0x1a   :  { %230 = vmatmul.msk.bf16.gmra.mxu2 %vm91_vm0, %v238_v8  ;;  %232 = vmatmul.msk.bf16.gmra.mxu3 %vm91_vm0, %v240_v9 }
  0x86   :  { %v125_v11 = vpop.f32.mrf.mxu0  ;;  %v135_v12 = vpop.f32.mrf.mxu1 }
  0x87   :  { %v126_v13 = vadd.f32 %v249_v10, %v125_v11  ;;  %v136_v14 = vadd.f32 %v249_v10, %v135_v12 }
  0x89   :  { %165 = vst [vmem:[%s362_s3] sm:$0xff] %v126_v13 }
  0x8a   :  { %169 = vst [vmem:[%s362_s3 + $0x20] sm:$0xff] %v136_v14 }
  0x8d   :  { %v145_v15 = vpop.f32.mrf.mxu2  ;;  %v155_v16 = vpop.f32.mrf.mxu3 }
  0x8e   :  { %v146_v17 = vadd.f32 %v249_v10, %v145_v15  ;;  %v156_v18 = vadd.f32 %v249_v10, %v155_v16  ;;  %v127_v19 = vpop.f32.mrf.mxu0  ;;  %v137_v20 = vpop.f32.mrf.mxu1 }
  0x8f   :  { %v128_v21 = vadd.f32 %v249_v10, %v127_v19  ;;  %v138_v22 = vadd.f32 %v249_v10, %v137_v20 }
  0x90   :  { %173 = vst [vmem:[%s362_s3 + $0x40] sm:$0xff] %v146_v17 }
  0x91   :  { %177 = vst [vmem:[%s362_s3 + $0x60] sm:$0xff] %v156_v18 }
  0x92   :  { %166 = vst [vmem:[%s362_s3 + $0x8] sm:$0xff] %v128_v21 }
  0x93   :  { %170 = vst [vmem:[%s362_s3 + $0x28] sm:$0xff] %v138_v22 }
  0x95   :  { %v147_v23 = vpop.f32.mrf.mxu2  ;;  %v157_v24 = vpop.f32.mrf.mxu3 }
  0x96   :  { %v148_v25 = vadd.f32 %v249_v10, %v147_v23  ;;  %v158_v26 = vadd.f32 %v249_v10, %v157_v24  ;;  %v130_v27 = vpop.f32.mrf.mxu0  ;;  %v140_v28 = vpop.f32.mrf.mxu1 }
  0x97   :  { %v131_v29 = vadd.f32 %v249_v10, %v130_v27  ;;  %v141_v30 = vadd.f32 %v249_v10, %v140_v28 }
  0x98   :  { %174 = vst [vmem:[%s362_s3 + $0x48] sm:$0xff] %v148_v25 }
  0x99   :  { %178 = vst [vmem:[%s362_s3 + $0x68] sm:$0xff] %v158_v26 }
  0x9a   :  { %167 = vst [vmem:[%s362_s3 + $0x10] sm:$0xff] %v131_v29 }
  0x9b   :  { %171 = vst [vmem:[%s362_s3 + $0x30] sm:$0xff] %v141_v30 }
  0x9d   :  { %v150_v31 = vpop.f32.mrf.mxu2  ;;  %v160_v32 = vpop.f32.mrf.mxu3 }
  0x9e   :  { %v151_v33 = vadd.f32 %v249_v10, %v150_v31  ;;  %v161_v34 = vadd.f32 %v249_v10, %v160_v32  ;;  %v132_v35 = vpop.f32.mrf.mxu0  ;;  %v142_v36 = vpop.f32.mrf.mxu1 }
  0x9f   :  { %v133_v37 = vadd.f32 %v249_v10, %v132_v35  ;;  %v143_v38 = vadd.f32 %v249_v10, %v142_v36 }
  0xa0   :  { %175 = vst [vmem:[%s362_s3 + $0x50] sm:$0xff] %v151_v33 }
  0xa1   :  { %179 = vst [vmem:[%s362_s3 + $0x70] sm:$0xff] %v161_v34 }
  0xa2   :  { %168 = vst [vmem:[%s362_s3 + $0x18] sm:$0xff] %v133_v37 }
  0xa3   :  { %172 = vst [vmem:[%s362_s3 + $0x38] sm:$0xff] %v143_v38 }
  0xa5   :  { %v152_v39 = vpop.f32.mrf.mxu2  ;;  %v162_v40 = vpop.f32.mrf.mxu3 }
  0xa6   :  { %v153_v41 = vadd.f32 %v249_v10, %v152_v39  ;;  %v163_v42 = vadd.f32 %v249_v10, %v162_v40 }
  0xa8   :  { %176 = vst [vmem:[%s362_s3 + $0x58] sm:$0xff] %v153_v41 }
  0xa9   :  { %180 = vst [vmem:[%s362_s3 + $0x78] sm:$0xff] %v163_v42 }

// kernel: poetry_model_forward.6
= control target key start
LH: loop header
LB: loop body
LE: loop exit
PB: predicated region body
PF: predicated region fallthrough
CT: control target
= control target key end

     0   :  { %vm27_vm0 = vcmask 261120   ;;  %s1640_s10 = smov 96   ;;  %s1641_s11 = smov 64   ;;  %s2072_s1 = inlined_call_operand.vmem [shape: bf16[32,128], index: 1, kind: input, shape index: {}]   ;;  %s2073_s2 = inlined_call_operand.vmem [shape: f32[16,32], index: 2, kind: input, shape index: {}, may-alias: {2,3}]   ;;  %s2074_s3 = inlined_call_operand.vmem [shape: f32[16,32], index: 3, kind: input, shape index: {}, may-alias: {2,3}]   ;;  %s2075_s0 = inlined_call_operand.vmem [shape: bf16[8,16,128], index: 0, kind: input, shape index: {}]   ;;  %s2076_s4 = inlined_call_operand.vmem [shape: bf16[8,16,32], index: 4, kind: output, shape index: {0}]   ;;  %s2077_s6 = inlined_call_operand.vmem [shape: f32[16,32], index: 6, kind: output, shape index: {2}]   ;;  %s2078_s5 = inlined_call_operand.vmem [shape: f32[16,32], index: 5, kind: output, shape index: {1}]  }
   0x1   :  { %v1454_v0 = vld [vmem:[%s2072_s1 + $0x8] sm:$0xff]  ;;  %v25_v1 = vld [vmem:[%s2073_s2] sm:$0xff] }
   0x2   :  { %v26_v2 = vld [vmem:[%s2073_s2 + $0x8] sm:$0xff]  ;;  %28 = vst.msk [vmem:[#allocation2] sm:$0xff] %vm27_vm0, %v25_v1  ;;  %v30_v3 = vld [vmem:[%s2074_s3] sm:$0xff]  ;;  %67 = vmatpush.bf16.msra.mxu0 %v1454_v0  ;;  %s1639_s2 = smov 32  }
   0x3   :  { %v31_v4 = vld [vmem:[%s2074_s3 + $0x8] sm:$0xff]  ;;  %v1453_v5 = vld [vmem:[%s2072_s1] sm:$0xff]  ;;  %29 = vst.msk [vmem:[#allocation2 + $0x8] sm:$0xff] %vm27_vm0, %v26_v2 }
   0x4   :  { %32 = vst.msk [vmem:[#allocation3] sm:$0xff] %vm27_vm0, %v30_v3  ;;  %v1470_v11 = vld [vmem:[%s2075_s0] sm:$0xff]   ;;  %v1456_v3 = vld [vmem:[%s2072_s1 + $0x8] sm:$0xff] }
   0x5   :  { %33 = vst.msk [vmem:[#allocation3 + $0x8] sm:$0xff] %vm27_vm0, %v31_v4  ;;  %v1471_v12 = vunpack.c.l.bf16 %v1470_v11  ;;  %v1472_v15 = vunpack.c.h.bf16 %v1470_v11  ;;  %227 = vmatpush.bf16.msra.mxu1 %v1456_v3  ;;  %v1455_v4 = vld [vmem:[%s2072_s1] sm:$0xff] }
   0x6   :  { %68 = vmatpush.bf16.msra.mxu0 %v1453_v5 }
   0x9   :  { %v34_v6 = vld [vmem:[#allocation2] sm:$0xff]  ;;  %228 = vmatpush.bf16.msra.mxu1 %v1455_v4  ;;  %v1458_v4 = vld [vmem:[%s2072_s1 + $0x8] sm:$0xff] }
   0xa   :  { %v35_v7 = vld [vmem:[#allocation2 + $0x8] sm:$0xff]  ;;  %387 = vmatpush.bf16.msra.mxu2 %v1458_v4 }
   0xb   :  { %v40_v8 = vpack.c.bf16 %v35_v7, %v34_v6  ;;  %v36_v9 = vld [vmem:[#allocation3] sm:$0xff] }
   0xc   :  { %121 = vrot.lane.b32.xlu1 %v36_v9, %s1639_s2  ;;  %v37_v10 = vld [vmem:[#allocation3 + $0x8] sm:$0xff] }
   0xd   :  { %1345 = vmatmul.msk.bf16.vlgmr.msra.gmra.mxu0 %vm27_vm0, %v40_v8 }
  0x14   :  { %123 = vrot.lane.b32.xlu1 %v37_v10, %s1639_s2  ;;  %v1501_v10 = vld [vmem:[%s2075_s0 + $0x8] sm:$0xff]  }
  0x15   :  { %v1475_v11 = vunpack.c.l.bf16 %v1501_v10 }
  0x7e   :  { %v122_v50 = vpop.permute.xlu1 %121 }
  0x86   :  { %v124_v54 = vpop.permute.xlu1 %123 }
  0x8a   :  { %v70_v13 = vpop.f32.mrf.mxu0 }
  0x8b   :  { %v77_v14 = vadd.f32 %v1471_v12, %v70_v13 }
  0x8d   :  { %1511 = vtanh.f32 %v77_v14  ;;  %v1346_v20 = vmul.f32 -1.442695, %v77_v14  ;;  %v1476_v14 = vunpack.c.h.bf16 %v1501_v10 }
  0x92   :  { %v72_v16 = vpop.f32.mrf.mxu0 }
  0x93   :  { %v1512_v17 = vpop.eup %1511  ;;  %v78_v18 = vadd.f32 %v1472_v15, %v72_v16 }
  0x94   :  { %131 = vrot.lane.b32.xlu0 %v1512_v17, %s1639_s2 }
  0x95   :  { %1513 = vtanh.f32 %v78_v18  ;;  %v1347_v21 = vmul.f32 -1.442695, %v78_v18 }
  0x96   :  { %1515 = vpow2.f32 %v1346_v20 }
  0x97   :  { %1517 = vpow2.f32 %v1347_v21 }
  0x9b   :  { %v1514_v19 = vpop.eup %1513 }
  0x9c   :  { %133 = vrot.lane.b32.xlu0 %v1514_v19, %s1639_s2  ;;  %v1516_v22 = vpop.eup %1515 }
  0x9d   :  { %v85_v23 = vadd.f32 1.0, %v1516_v22  ;;  %v1518_v24 = vpop.eup %1517 }
  0x9e   :  { %v86_v25 = vadd.f32 1.0, %v1518_v24 }
  0x9f   :  { %1519 = vrcp.f32 %v85_v23  ;;  %v98_v34 = vand.u32 2147483648, %v85_v23  ;;  %vm92_vm2 = vweird.f32 %v85_v23  ;;  %v96_v35 = vand.u32 2147483647, %v85_v23 }
  0xa0   :  { %1521 = vrcp.f32 %v86_v25  ;;  %v113_v43 = vand.u32 2147483648, %v86_v25  ;;  %vm107_vm6 = vweird.f32 %v86_v25  ;;  %v111_v44 = vand.u32 2147483647, %v86_v25 }
  0xa1   :  { %v99_v38 = vor.u32 1.1754944e-38, %v98_v34  ;;  %vm97_vm4 = vcmp.eq.f32.partialorder %v96_v35, 8.507059e+37 }
  0xa2   :  { %v114_v46 = vor.u32 1.1754944e-38, %v113_v43  ;;  %vm112_vm8 = vcmp.eq.f32.partialorder %v111_v44, 8.507059e+37 }
  0xa5   :  { %v1520_v26 = vpop.eup %1519 }
  0xa6   :  { %v88_v27 = vmul.f32 %v1520_v26, %v85_v23  ;;  %v1522_v29 = vpop.eup %1521  ;;  %vm93_vm1 = vweird.f32 %v1520_v26 }
  0xa7   :  { %v103_v31 = vmul.f32 %v1522_v29, %v86_v25  ;;  %vm94_vm3 = vmor %vm92_vm2, %vm93_vm1  ;;  %vm108_vm5 = vweird.f32 %v1522_v29 }
  0xa8   :  { %v89_v28 = vsub.f32 1.0, %v88_v27  ;;  %vm109_vm7 = vmor %vm107_vm6, %vm108_vm5 }
  0xa9   :  { %v104_v33 = vsub.f32 1.0, %v103_v31 }
  0xaa   :  { %v90_v30 = vmul.f32 %v1520_v26, %v89_v28 }
  0xab   :  { %v105_v37 = vmul.f32 %v1522_v29, %v104_v33 }
  0xac   :  { %v91_v32 = vadd.f32 %v1520_v26, %v90_v30 }
  0xad   :  { %v106_v41 = vadd.f32 %v1522_v29, %v105_v37 }
  0xae   :  { %v95_v36 = vsel %vm94_vm3, %v1520_v26, %v91_v32 }
  0xaf   :  { %v100_v39 = vsel %vm97_vm4, %v99_v38, %v95_v36  ;;  %v110_v45 = vsel %vm109_vm7, %v1522_v29, %v106_v41 }
  0xb0   :  { %v115_v47 = vsel %vm112_vm8, %v114_v46, %v110_v45  ;;  %v127_v51 = vmul.f32 %v122_v50, %v100_v39 }
  0xb1   :  { %v128_v55 = vmul.f32 %v124_v54, %v115_v47 }
 0x106   :  { %v132_v40 = vpop.permute.xlu0 %131 }
 0x107   :  { %v137_v42 = vmul.f32 %v132_v40, %v100_v39 }
 0x109   :  { %141 = vrot.lane.b32.xlu2 %v137_v42, %s1639_s2 }
 0x10e   :  { %v134_v48 = vpop.permute.xlu0 %133 }
 0x10f   :  { %v138_v49 = vmul.f32 %v134_v48, %v115_v47 }
 0x111   :  { %143 = vrot.lane.b32.xlu2 %v138_v49, %s1639_s2 }
 0x163   :  { %v142_v52 = vpop.permute.xlu2 %141 }
 0x164   :  { %v147_v53 = vadd.f32 %v142_v52, %v127_v51 }
 0x166   :  { %1523 = vtanh.f32 %v147_v53 }
 0x16b   :  { %v144_v56 = vpop.permute.xlu2 %143 }
 0x16c   :  { %v1524_v57 = vpop.eup %1523  ;;  %v148_v58 = vadd.f32 %v144_v56, %v128_v55 }
 0x16d   :  { %153 = vrot.lane.b32.xlu0 %v1524_v57, %s1639_s2 }
 0x16e   :  { %1525 = vtanh.f32 %v148_v58 }
 0x174   :  { %v1526_v59 = vpop.eup %1525 }
 0x175   :  { %155 = vrot.lane.b32.xlu1 %v1526_v59, %s1639_s2 }
 0x17d   :  { %173 = vrot.lane.b32.xlu1 %v147_v53, %s1640_s10 }
 0x1df   :  { %v154_v60 = vpop.permute.xlu0 %153 }
 0x1e0   :  { %v1712_v61 = vmul.f32 %v154_v60, %v100_v39 }
 0x1e2   :  { %163 = vrot.lane.b32.xlu2 %v1712_v61, %s1641_s11 }
 0x1e7   :  { %v156_v62 = vpop.permute.xlu1 %155 }
 0x1e8   :  { %v1716_v63 = vmul.f32 %v156_v62, %v115_v47 }
 0x1ea   :  { %165 = vrot.lane.b32.xlu0 %v1716_v63, %s1641_s11  ;;  %175 = vrot.lane.b32.xlu2 %v148_v58, %s1640_s10 }
 0x1ef   :  { %v174_v0 = vpop.permute.xlu1 %173 }
 0x1f0   :  { %179 = vst.msk [vmem:[#allocation3] sm:$0xff] %vm27_vm0, %v174_v0 }
 0x1f7   :  { %v196_v1 = vld [vmem:[#allocation3] sm:$0xff] }
 0x1f8   :  { %281 = vrot.lane.b32.xlu2 %v196_v1, %s1639_s2 }
 0x23c   :  { %v164_v2 = vpop.permute.xlu2 %163 }
 0x23d   :  { %169 = vst.msk [vmem:[#allocation2] sm:$0xff] %vm27_vm0, %v164_v2 }
 0x244   :  { %v176_v5 = vpop.permute.xlu2 %175  ;;  %v194_v7 = vld [vmem:[#allocation2] sm:$0xff] }
 0x245   :  { %180 = vst.msk [vmem:[#allocation3 + $0x8] sm:$0xff] %vm27_vm0, %v176_v5  ;;  %v1457_v5 = vld [vmem:[%s2072_s1] sm:$0xff] }
 0x246   :  { %388 = vmatpush.bf16.msra.mxu2 %v1457_v5 }
 0x24c   :  { %v197_v19 = vld [vmem:[#allocation3 + $0x8] sm:$0xff] }
 0x252   :  { %v282_v50 = vpop.permute.xlu2 %281 }
 0x25c   :  { %v166_v6 = vpop.permute.xlu0 %165 }
 0x25d   :  { %170 = vst.msk [vmem:[#allocation2 + $0x8] sm:$0xff] %vm27_vm0, %v166_v6 }
 0x264   :  { %v195_v8 = vld [vmem:[#allocation2 + $0x8] sm:$0xff] }
 0x265   :  { %v201_v9 = vpack.c.bf16 %v195_v8, %v194_v7 }
 0x267   :  { %1358 = vmatmul.msk.bf16.vlgmr.msra.gmra.mxu1 %vm27_vm0, %v201_v9 }
 0x2e4   :  { %v230_v12 = vpop.f32.mrf.mxu1 }
 0x2e5   :  { %v237_v13 = vadd.f32 %v1475_v11, %v230_v12  ;;  %v1502_v12 = vld [vmem:[%s2075_s0 + $0x10] sm:$0xff]  }
 0x2e7   :  { %1527 = vtanh.f32 %v237_v13  ;;  %v1359_v20 = vmul.f32 -1.442695, %v237_v13  ;;  %v1479_v13 = vunpack.c.l.bf16 %v1502_v12 }
 0x2ec   :  { %v232_v15 = vpop.f32.mrf.mxu1 }
 0x2ed   :  { %v1528_v16 = vpop.eup %1527  ;;  %v238_v17 = vadd.f32 %v1476_v14, %v232_v15 }
 0x2ee   :  { %291 = vrot.lane.b32.xlu0 %v1528_v16, %s1639_s2  ;;  %v1480_v16 = vunpack.c.h.bf16 %v1502_v12 }
 0x2ef   :  { %1529 = vtanh.f32 %v238_v17  ;;  %v1360_v21 = vmul.f32 -1.442695, %v238_v17 }
 0x2f0   :  { %1531 = vpow2.f32 %v1359_v20 }
 0x2f1   :  { %1533 = vpow2.f32 %v1360_v21 }
 0x2f5   :  { %v1530_v18 = vpop.eup %1529 }
 0x2f6   :  { %283 = vrot.lane.b32.xlu0 %v197_v19, %s1639_s2  ;;  %293 = vrot.lane.b32.xlu1 %v1530_v18, %s1639_s2  ;;  %v1532_v22 = vpop.eup %1531 }
 0x2f7   :  { %v245_v23 = vadd.f32 1.0, %v1532_v22  ;;  %v1534_v24 = vpop.eup %1533 }
 0x2f8   :  { %v246_v25 = vadd.f32 1.0, %v1534_v24 }
 0x2f9   :  { %1535 = vrcp.f32 %v245_v23  ;;  %v258_v34 = vand.u32 2147483648, %v245_v23  ;;  %vm252_vm10 = vweird.f32 %v245_v23  ;;  %v256_v35 = vand.u32 2147483647, %v245_v23 }
 0x2fa   :  { %1537 = vrcp.f32 %v246_v25  ;;  %v273_v43 = vand.u32 2147483648, %v246_v25  ;;  %vm267_vm14 = vweird.f32 %v246_v25  ;;  %v271_v44 = vand.u32 2147483647, %v246_v25 }
 0x2fb   :  { %v259_v38 = vor.u32 1.1754944e-38, %v258_v34  ;;  %vm257_vm12 = vcmp.eq.f32.partialorder %v256_v35, 8.507059e+37 }
 0x2fc   :  { %v274_v46 = vor.u32 1.1754944e-38, %v273_v43  ;;  %vm272_vm1 = vcmp.eq.f32.partialorder %v271_v44, 8.507059e+37 }
 0x2ff   :  { %v1536_v26 = vpop.eup %1535 }
 0x300   :  { %v248_v27 = vmul.f32 %v1536_v26, %v245_v23  ;;  %v1538_v29 = vpop.eup %1537  ;;  %vm253_vm9 = vweird.f32 %v1536_v26 }
 0x301   :  { %v263_v31 = vmul.f32 %v1538_v29, %v246_v25  ;;  %vm254_vm11 = vmor %vm252_vm10, %vm253_vm9  ;;  %vm268_vm13 = vweird.f32 %v1538_v29 }
 0x302   :  { %v249_v28 = vsub.f32 1.0, %v248_v27  ;;  %vm269_vm15 = vmor %vm267_vm14, %vm268_vm13 }
 0x303   :  { %v264_v33 = vsub.f32 1.0, %v263_v31 }
 0x304   :  { %v250_v30 = vmul.f32 %v1536_v26, %v249_v28 }
 0x305   :  { %v265_v37 = vmul.f32 %v1538_v29, %v264_v33 }
 0x306   :  { %v251_v32 = vadd.f32 %v1536_v26, %v250_v30 }
 0x307   :  { %v266_v42 = vadd.f32 %v1538_v29, %v265_v37 }
 0x308   :  { %v255_v36 = vsel %vm254_vm11, %v1536_v26, %v251_v32 }
 0x309   :  { %v260_v40 = vsel %vm257_vm12, %v259_v38, %v255_v36  ;;  %v270_v45 = vsel %vm269_vm15, %v1538_v29, %v266_v42 }
 0x30a   :  { %v275_v47 = vsel %vm272_vm1, %v274_v46, %v270_v45  ;;  %v287_v56 = vmul.f32 %v282_v50, %v260_v40 }
 0x360   :  { %v292_v39 = vpop.permute.xlu0 %291 }
 0x361   :  { %v297_v41 = vmul.f32 %v292_v39, %v260_v40 }
 0x363   :  { %301 = vrot.lane.b32.xlu1 %v297_v41, %s1639_s2 }
 0x368   :  { %v294_v48 = vpop.permute.xlu1 %293  ;;  %v284_v51 = vpop.permute.xlu0 %283 }
 0x369   :  { %v298_v49 = vmul.f32 %v294_v48, %v275_v47  ;;  %v288_v52 = vmul.f32 %v284_v51, %v275_v47 }
 0x36b   :  { %303 = vrot.lane.b32.xlu2 %v298_v49, %s1639_s2 }
 0x3c5   :  { %v304_v53 = vpop.permute.xlu2 %303 }
 0x3c6   :  { %v308_v54 = vadd.f32 %v304_v53, %v288_v52 }
 0x3c8   :  { %1539 = vtanh.f32 %v308_v54 }
 0x3ce   :  { %v1540_v55 = vpop.eup %1539 }
 0x3cf   :  { %315 = vrot.lane.b32.xlu1 %v1540_v55, %s1639_s2 }
 0x3d5   :  { %v302_v57 = vpop.permute.xlu1 %301 }
 0x3d6   :  { %v307_v58 = vadd.f32 %v302_v57, %v287_v56 }
 0x3d8   :  { %1541 = vtanh.f32 %v307_v58  ;;  %333 = vrot.lane.b32.xlu1 %v307_v58, %s1640_s10 }
 0x3de   :  { %v1542_v59 = vpop.eup %1541 }
 0x3df   :  { %313 = vrot.lane.b32.xlu0 %v1542_v59, %s1639_s2 }
 0x441   :  { %v316_v60 = vpop.permute.xlu1 %315 }
 0x442   :  { %v1744_v62 = vmul.f32 %v316_v60, %v275_v47 }
 0x444   :  { %325 = vrot.lane.b32.xlu0 %v1744_v62, %s1641_s11 }
 0x44a   :  { %v334_v0 = vpop.permute.xlu1 %333 }
 0x44b   :  { %339 = vst.msk [vmem:[#allocation3] sm:$0xff] %vm27_vm0, %v334_v0 }
 0x451   :  { %v314_v1 = vpop.permute.xlu0 %313 }
 0x452   :  { %v1749_v2 = vmul.f32 %v314_v1, %v260_v40  ;;  %v356_v3 = vld [vmem:[#allocation3] sm:$0xff] }
 0x454   :  { %323 = vrot.lane.b32.xlu2 %v1749_v2, %s1641_s11 }
 0x45c   :  { %335 = vrot.lane.b32.xlu2 %v308_v54, %s1640_s10 }
 0x464   :  { %441 = vrot.lane.b32.xlu2 %v356_v3, %s1639_s2 }
 0x4ae   :  { %v324_v6 = vpop.permute.xlu2 %323 }
 0x4af   :  { %329 = vst.msk [vmem:[#allocation2] sm:$0xff] %vm27_vm0, %v324_v6 }
 0x4b6   :  { %v336_v7 = vpop.permute.xlu2 %335  ;;  %v326_v8 = vpop.permute.xlu0 %325  ;;  %v354_v9 = vld [vmem:[#allocation2] sm:$0xff] }
 0x4b7   :  { %340 = vst.msk [vmem:[#allocation3 + $0x8] sm:$0xff] %vm27_vm0, %v336_v7 }
 0x4b8   :  { %330 = vst.msk [vmem:[#allocation2 + $0x8] sm:$0xff] %vm27_vm0, %v326_v8  ;;  %v1460_v8 = vld [vmem:[%s2072_s1 + $0x8] sm:$0xff] }
 0x4b9   :  { %547 = vmatpush.bf16.msra.mxu3 %v1460_v8 }
 0x4be   :  { %v357_v21 = vld [vmem:[#allocation3 + $0x8] sm:$0xff]  ;;  %v442_v52 = vpop.permute.xlu2 %441 }
 0x4bf   :  { %v355_v10 = vld [vmem:[#allocation2 + $0x8] sm:$0xff] }
 0x4c0   :  { %v361_v11 = vpack.c.bf16 %v355_v10, %v354_v9  ;;  %v1459_v9 = vld [vmem:[%s2072_s1] sm:$0xff] }
 0x4c1   :  { %548 = vmatpush.bf16.msra.mxu3 %v1459_v9 }
 0x4c2   :  { %1373 = vmatmul.msk.bf16.vlgmr.msra.gmra.mxu2 %vm27_vm0, %v361_v11 }
 0x545   :  { %v390_v14 = vpop.f32.mrf.mxu2 }
 0x546   :  { %v397_v15 = vadd.f32 %v1479_v13, %v390_v14 }
 0x548   :  { %1543 = vtanh.f32 %v397_v15  ;;  %v1374_v22 = vmul.f32 -1.442695, %v397_v15 }
 0x54d   :  { %v392_v17 = vpop.f32.mrf.mxu2 }
 0x54e   :  { %v1544_v18 = vpop.eup %1543  ;;  %v398_v19 = vadd.f32 %v1480_v16, %v392_v17  ;;  %v1503_v16 = vld [vmem:[%s2075_s0 + $0x18] sm:$0xff]  }
 0x54f   :  { %451 = vrot.lane.b32.xlu0 %v1544_v18, %s1639_s2  ;;  %v1483_v17 = vunpack.c.l.bf16 %v1503_v16 }
 0x550   :  { %1545 = vtanh.f32 %v398_v19  ;;  %v1375_v23 = vmul.f32 -1.442695, %v398_v19 }
 0x551   :  { %1547 = vpow2.f32 %v1374_v22 }
 0x552   :  { %1549 = vpow2.f32 %v1375_v23 }
 0x556   :  { %v1546_v20 = vpop.eup %1545 }
 0x557   :  { %443 = vrot.lane.b32.xlu0 %v357_v21, %s1639_s2  ;;  %453 = vrot.lane.b32.xlu1 %v1546_v20, %s1639_s2  ;;  %v1548_v24 = vpop.eup %1547  ;;  %v1484_v20 = vunpack.c.h.bf16 %v1503_v16 }
 0x558   :  { %v405_v25 = vadd.f32 1.0, %v1548_v24  ;;  %v1550_v26 = vpop.eup %1549 }
 0x559   :  { %v406_v27 = vadd.f32 1.0, %v1550_v26 }
 0x55a   :  { %1551 = vrcp.f32 %v405_v25  ;;  %v418_v36 = vand.u32 2147483648, %v405_v25  ;;  %vm412_vm3 = vweird.f32 %v405_v25  ;;  %v416_v37 = vand.u32 2147483647, %v405_v25 }
 0x55b   :  { %1553 = vrcp.f32 %v406_v27  ;;  %v433_v45 = vand.u32 2147483648, %v406_v27  ;;  %vm427_vm7 = vweird.f32 %v406_v27  ;;  %v431_v46 = vand.u32 2147483647, %v406_v27 }
 0x55c   :  { %v419_v40 = vor.u32 1.1754944e-38, %v418_v36  ;;  %vm417_vm5 = vcmp.eq.f32.partialorder %v416_v37, 8.507059e+37 }
 0x55d   :  { %v434_v48 = vor.u32 1.1754944e-38, %v433_v45  ;;  %vm432_vm9 = vcmp.eq.f32.partialorder %v431_v46, 8.507059e+37 }
 0x560   :  { %v1552_v28 = vpop.eup %1551 }
 0x561   :  { %v408_v29 = vmul.f32 %v1552_v28, %v405_v25  ;;  %v1554_v31 = vpop.eup %1553  ;;  %vm413_vm2 = vweird.f32 %v1552_v28 }
 0x562   :  { %v423_v33 = vmul.f32 %v1554_v31, %v406_v27  ;;  %vm414_vm4 = vmor %vm412_vm3, %vm413_vm2  ;;  %vm428_vm6 = vweird.f32 %v1554_v31 }
 0x563   :  { %v409_v30 = vsub.f32 1.0, %v408_v29  ;;  %vm429_vm8 = vmor %vm427_vm7, %vm428_vm6 }
 0x564   :  { %v424_v35 = vsub.f32 1.0, %v423_v33 }
 0x565   :  { %v410_v32 = vmul.f32 %v1552_v28, %v409_v30 }
 0x566   :  { %v425_v39 = vmul.f32 %v1554_v31, %v424_v35 }
 0x567   :  { %v411_v34 = vadd.f32 %v1552_v28, %v410_v32 }
 0x568   :  { %v426_v44 = vadd.f32 %v1554_v31, %v425_v39 }
 0x569   :  { %v415_v38 = vsel %vm414_vm4, %v1552_v28, %v411_v34 }
 0x56a   :  { %v420_v42 = vsel %vm417_vm5, %v419_v40, %v415_v38  ;;  %v430_v47 = vsel %vm429_vm8, %v1554_v31, %v426_v44 }
 0x56b   :  { %v435_v49 = vsel %vm432_vm9, %v434_v48, %v430_v47  ;;  %v447_v58 = vmul.f32 %v442_v52, %v420_v42 }
 0x5c1   :  { %v452_v41 = vpop.permute.xlu0 %451 }
 0x5c2   :  { %v457_v43 = vmul.f32 %v452_v41, %v420_v42 }
 0x5c4   :  { %461 = vrot.lane.b32.xlu1 %v457_v43, %s1639_s2 }
 0x5c9   :  { %v454_v50 = vpop.permute.xlu1 %453  ;;  %v444_v53 = vpop.permute.xlu0 %443 }
 0x5ca   :  { %v458_v51 = vmul.f32 %v454_v50, %v435_v49  ;;  %v448_v54 = vmul.f32 %v444_v53, %v435_v49 }
 0x5cc   :  { %463 = vrot.lane.b32.xlu2 %v458_v51, %s1639_s2 }
 0x626   :  { %v464_v55 = vpop.permute.xlu2 %463 }
 0x627   :  { %v468_v56 = vadd.f32 %v464_v55, %v448_v54 }
 0x629   :  { %1555 = vtanh.f32 %v468_v56 }
 0x62f   :  { %v1556_v57 = vpop.eup %1555 }
 0x630   :  { %475 = vrot.lane.b32.xlu1 %v1556_v57, %s1639_s2 }
 0x636   :  { %v462_v59 = vpop.permute.xlu1 %461 }
 0x637   :  { %v467_v60 = vadd.f32 %v462_v59, %v447_v58 }
 0x639   :  { %1557 = vtanh.f32 %v467_v60  ;;  %493 = vrot.lane.b32.xlu1 %v467_v60, %s1640_s10 }
 0x63f   :  { %v1558_v0 = vpop.eup %1557 }
 0x640   :  { %473 = vrot.lane.b32.xlu0 %v1558_v0, %s1639_s2 }
 0x6a2   :  { %v476_v1 = vpop.permute.xlu1 %475 }
 0x6a3   :  { %v1776_v3 = vmul.f32 %v476_v1, %v435_v49 }
 0x6a5   :  { %485 = vrot.lane.b32.xlu0 %v1776_v3, %s1641_s11 }
 0x6ab   :  { %v494_v4 = vpop.permute.xlu1 %493 }
 0x6ac   :  { %499 = vst.msk [vmem:[#allocation3] sm:$0xff] %vm27_vm0, %v494_v4 }
 0x6b2   :  { %v474_v5 = vpop.permute.xlu0 %473 }
 0x6b3   :  { %v1781_v6 = vmul.f32 %v474_v5, %v420_v42  ;;  %v516_v7 = vld [vmem:[#allocation3] sm:$0xff] }
 0x6b5   :  { %483 = vrot.lane.b32.xlu2 %v1781_v6, %s1641_s11 }
 0x6bd   :  { %495 = vrot.lane.b32.xlu2 %v468_v56, %s1640_s10 }
 0x6c5   :  { %601 = vrot.lane.b32.xlu2 %v516_v7, %s1639_s2 }
 0x70f   :  { %v484_v10 = vpop.permute.xlu2 %483 }
 0x710   :  { %489 = vst.msk [vmem:[#allocation2] sm:$0xff] %vm27_vm0, %v484_v10 }
 0x717   :  { %v496_v11 = vpop.permute.xlu2 %495  ;;  %v486_v12 = vpop.permute.xlu0 %485  ;;  %v514_v13 = vld [vmem:[#allocation2] sm:$0xff] }
 0x718   :  { %500 = vst.msk [vmem:[#allocation3 + $0x8] sm:$0xff] %vm27_vm0, %v496_v11 }
 0x719   :  { %490 = vst.msk [vmem:[#allocation2 + $0x8] sm:$0xff] %vm27_vm0, %v486_v12 }
 0x71f   :  { %v517_v25 = vld [vmem:[#allocation3 + $0x8] sm:$0xff]  ;;  %v602_v56 = vpop.permute.xlu2 %601 }
 0x720   :  { %v515_v14 = vld [vmem:[#allocation2 + $0x8] sm:$0xff] }
 0x721   :  { %v521_v15 = vpack.c.bf16 %v515_v14, %v514_v13  ;;  %v1462_v14 = vld [vmem:[%s2072_s1 + $0x8] sm:$0xff] }
 0x722   :  { %707 = vmatpush.bf16.msrb.mxu0 %v1462_v14 }
 0x723   :  { %1388 = vmatmul.msk.bf16.vlgmr.msra.gmra.mxu3 %vm27_vm0, %v521_v15  ;;  %v1461_v15 = vld [vmem:[%s2072_s1] sm:$0xff] }
 0x726   :  { %708 = vmatpush.bf16.msrb.mxu0 %v1461_v15 }
 0x7a6   :  { %v550_v18 = vpop.f32.mrf.mxu3 }
 0x7a7   :  { %v557_v19 = vadd.f32 %v1483_v17, %v550_v18 }
 0x7a9   :  { %1559 = vtanh.f32 %v557_v19  ;;  %v1389_v26 = vmul.f32 -1.442695, %v557_v19 }
 0x7ae   :  { %v552_v21 = vpop.f32.mrf.mxu3 }
 0x7af   :  { %v1560_v22 = vpop.eup %1559  ;;  %v558_v23 = vadd.f32 %v1484_v20, %v552_v21 }
 0x7b0   :  { %611 = vrot.lane.b32.xlu0 %v1560_v22, %s1639_s2  ;;  %v1504_v22 = vld [vmem:[%s2075_s0 + $0x20] sm:$0xff]  }
 0x7b1   :  { %1561 = vtanh.f32 %v558_v23  ;;  %v1390_v27 = vmul.f32 -1.442695, %v558_v23  ;;  %v1487_v23 = vunpack.c.l.bf16 %v1504_v22 }
 0x7b2   :  { %1563 = vpow2.f32 %v1389_v26  ;;  %v1488_v26 = vunpack.c.h.bf16 %v1504_v22  ;;  %v1464_v22 = vld [vmem:[%s2072_s1 + $0x8] sm:$0xff] }
 0x7b3   :  { %1565 = vpow2.f32 %v1390_v27  ;;  %867 = vmatpush.bf16.msrb.mxu1 %v1464_v22 }
 0x7b7   :  { %v1562_v24 = vpop.eup %1561 }
 0x7b8   :  { %603 = vrot.lane.b32.xlu0 %v517_v25, %s1639_s2  ;;  %613 = vrot.lane.b32.xlu1 %v1562_v24, %s1639_s2  ;;  %v1564_v28 = vpop.eup %1563 }
 0x7b9   :  { %v565_v29 = vadd.f32 1.0, %v1564_v28  ;;  %v1566_v30 = vpop.eup %1565 }
 0x7ba   :  { %v566_v31 = vadd.f32 1.0, %v1566_v30 }
 0x7bb   :  { %1567 = vrcp.f32 %v565_v29  ;;  %v578_v40 = vand.u32 2147483648, %v565_v29  ;;  %vm572_vm11 = vweird.f32 %v565_v29  ;;  %v576_v41 = vand.u32 2147483647, %v565_v29 }
 0x7bc   :  { %1569 = vrcp.f32 %v566_v31  ;;  %v593_v49 = vand.u32 2147483648, %v566_v31  ;;  %vm587_vm15 = vweird.f32 %v566_v31  ;;  %v591_v50 = vand.u32 2147483647, %v566_v31 }
 0x7bd   :  { %v579_v44 = vor.u32 1.1754944e-38, %v578_v40  ;;  %vm577_vm13 = vcmp.eq.f32.partialorder %v576_v41, 8.507059e+37 }
 0x7be   :  { %v594_v52 = vor.u32 1.1754944e-38, %v593_v49  ;;  %vm592_vm2 = vcmp.eq.f32.partialorder %v591_v50, 8.507059e+37 }
 0x7c1   :  { %v1568_v32 = vpop.eup %1567 }
 0x7c2   :  { %v568_v33 = vmul.f32 %v1568_v32, %v565_v29  ;;  %v1570_v35 = vpop.eup %1569  ;;  %vm573_vm10 = vweird.f32 %v1568_v32 }
 0x7c3   :  { %v583_v37 = vmul.f32 %v1570_v35, %v566_v31  ;;  %vm574_vm12 = vmor %vm572_vm11, %vm573_vm10  ;;  %vm588_vm14 = vweird.f32 %v1570_v35 }
 0x7c4   :  { %v569_v34 = vsub.f32 1.0, %v568_v33  ;;  %vm589_vm1 = vmor %vm587_vm15, %vm588_vm14 }
 0x7c5   :  { %v584_v39 = vsub.f32 1.0, %v583_v37 }
 0x7c6   :  { %v570_v36 = vmul.f32 %v1568_v32, %v569_v34 }
 0x7c7   :  { %v585_v43 = vmul.f32 %v1570_v35, %v584_v39 }
 0x7c8   :  { %v571_v38 = vadd.f32 %v1568_v32, %v570_v36 }
 0x7c9   :  { %v586_v48 = vadd.f32 %v1570_v35, %v585_v43 }
 0x7ca   :  { %v575_v42 = vsel %vm574_vm12, %v1568_v32, %v571_v38 }
 0x7cb   :  { %v580_v46 = vsel %vm577_vm13, %v579_v44, %v575_v42  ;;  %v590_v51 = vsel %vm589_vm1, %v1570_v35, %v586_v48 }
 0x7cc   :  { %v595_v53 = vsel %vm592_vm2, %v594_v52, %v590_v51  ;;  %v607_v1 = vmul.f32 %v602_v56, %v580_v46 }
 0x822   :  { %v612_v45 = vpop.permute.xlu0 %611 }
 0x823   :  { %v617_v47 = vmul.f32 %v612_v45, %v580_v46 }
 0x825   :  { %621 = vrot.lane.b32.xlu1 %v617_v47, %s1639_s2 }
 0x82a   :  { %v614_v54 = vpop.permute.xlu1 %613  ;;  %v604_v57 = vpop.permute.xlu0 %603 }
 0x82b   :  { %v618_v55 = vmul.f32 %v614_v54, %v595_v53  ;;  %v608_v58 = vmul.f32 %v604_v57, %v595_v53 }
 0x82d   :  { %623 = vrot.lane.b32.xlu2 %v618_v55, %s1639_s2 }
 0x887   :  { %v624_v59 = vpop.permute.xlu2 %623 }
 0x888   :  { %v628_v60 = vadd.f32 %v624_v59, %v608_v58 }
 0x88a   :  { %1571 = vtanh.f32 %v628_v60 }
 0x890   :  { %v1572_v0 = vpop.eup %1571 }
 0x891   :  { %635 = vrot.lane.b32.xlu1 %v1572_v0, %s1639_s2 }
 0x897   :  { %v622_v4 = vpop.permute.xlu1 %621 }
 0x898   :  { %v627_v5 = vadd.f32 %v622_v4, %v607_v1 }
 0x89a   :  { %1573 = vtanh.f32 %v627_v5  ;;  %653 = vrot.lane.b32.xlu1 %v627_v5, %s1640_s10 }
 0x8a0   :  { %v1574_v7 = vpop.eup %1573 }
 0x8a1   :  { %633 = vrot.lane.b32.xlu0 %v1574_v7, %s1639_s2 }
 0x903   :  { %v636_v8 = vpop.permute.xlu1 %635 }
 0x904   :  { %v1808_v9 = vmul.f32 %v636_v8, %v595_v53 }
 0x906   :  { %645 = vrot.lane.b32.xlu0 %v1808_v9, %s1641_s11 }
 0x90c   :  { %v654_v10 = vpop.permute.xlu1 %653 }
 0x90d   :  { %659 = vst.msk [vmem:[#allocation3] sm:$0xff] %vm27_vm0, %v654_v10 }
 0x913   :  { %v634_v11 = vpop.permute.xlu0 %633 }
 0x914   :  { %v1813_v12 = vmul.f32 %v634_v11, %v580_v46  ;;  %v676_v13 = vld [vmem:[#allocation3] sm:$0xff] }
 0x916   :  { %643 = vrot.lane.b32.xlu2 %v1813_v12, %s1641_s11 }
 0x91e   :  { %655 = vrot.lane.b32.xlu2 %v628_v60, %s1640_s10 }
 0x926   :  { %761 = vrot.lane.b32.xlu2 %v676_v13, %s1639_s2 }
 0x970   :  { %v644_v16 = vpop.permute.xlu2 %643 }
 0x971   :  { %649 = vst.msk [vmem:[#allocation2] sm:$0xff] %vm27_vm0, %v644_v16 }
 0x978   :  { %v656_v17 = vpop.permute.xlu2 %655  ;;  %v646_v18 = vpop.permute.xlu0 %645  ;;  %v674_v19 = vld [vmem:[#allocation2] sm:$0xff] }
 0x979   :  { %660 = vst.msk [vmem:[#allocation3 + $0x8] sm:$0xff] %vm27_vm0, %v656_v17 }
 0x97a   :  { %650 = vst.msk [vmem:[#allocation2 + $0x8] sm:$0xff] %vm27_vm0, %v646_v18 }
 0x980   :  { %v677_v31 = vld [vmem:[#allocation3 + $0x8] sm:$0xff]  ;;  %v762_v1 = vpop.permute.xlu2 %761 }
 0x981   :  { %v675_v20 = vld [vmem:[#allocation2 + $0x8] sm:$0xff] }
 0x982   :  { %v681_v21 = vpack.c.bf16 %v675_v20, %v674_v19 }
 0x984   :  { %1403 = vmatmul.msk.bf16.vlgmr.msrb.gmra.mxu0 %vm27_vm0, %v681_v21 }
 0xa01   :  { %v710_v24 = vpop.f32.mrf.mxu0 }
 0xa02   :  { %v717_v25 = vadd.f32 %v1487_v23, %v710_v24  ;;  %v1463_v23 = vld [vmem:[%s2072_s1] sm:$0xff] }
 0xa03   :  { %868 = vmatpush.bf16.msrb.mxu1 %v1463_v23 }
 0xa04   :  { %1575 = vtanh.f32 %v717_v25  ;;  %v1404_v32 = vmul.f32 -1.442695, %v717_v25 }
 0xa09   :  { %v712_v27 = vpop.f32.mrf.mxu0 }
 0xa0a   :  { %v1576_v28 = vpop.eup %1575  ;;  %v718_v29 = vadd.f32 %v1488_v26, %v712_v27 }
 0xa0b   :  { %771 = vrot.lane.b32.xlu0 %v1576_v28, %s1639_s2 }
 0xa0c   :  { %1577 = vtanh.f32 %v718_v29  ;;  %v1405_v33 = vmul.f32 -1.442695, %v718_v29 }
 0xa0d   :  { %1579 = vpow2.f32 %v1404_v32 }
 0xa0e   :  { %1581 = vpow2.f32 %v1405_v33 }
 0xa12   :  { %v1578_v30 = vpop.eup %1577 }
 0xa13   :  { %763 = vrot.lane.b32.xlu0 %v677_v31, %s1639_s2  ;;  %773 = vrot.lane.b32.xlu1 %v1578_v30, %s1639_s2  ;;  %v1580_v34 = vpop.eup %1579  ;;  %v1505_v30 = vld [vmem:[%s2075_s0 + $0x28] sm:$0xff]  }
 0xa14   :  { %v725_v35 = vadd.f32 1.0, %v1580_v34  ;;  %v1582_v36 = vpop.eup %1581  ;;  %v1491_v31 = vunpack.c.l.bf16 %v1505_v30  ;;  %v1492_v34 = vunpack.c.h.bf16 %v1505_v30 }
 0xa15   :  { %v726_v37 = vadd.f32 1.0, %v1582_v36 }
 0xa16   :  { %1583 = vrcp.f32 %v725_v35  ;;  %v738_v46 = vand.u32 2147483648, %v725_v35  ;;  %vm732_vm4 = vweird.f32 %v725_v35  ;;  %v736_v47 = vand.u32 2147483647, %v725_v35 }
 0xa17   :  { %1585 = vrcp.f32 %v726_v37  ;;  %v753_v55 = vand.u32 2147483648, %v726_v37  ;;  %vm747_vm8 = vweird.f32 %v726_v37  ;;  %v751_v56 = vand.u32 2147483647, %v726_v37 }
 0xa18   :  { %v739_v50 = vor.u32 1.1754944e-38, %v738_v46  ;;  %vm737_vm6 = vcmp.eq.f32.partialorder %v736_v47, 8.507059e+37 }
 0xa19   :  { %v754_v58 = vor.u32 1.1754944e-38, %v753_v55  ;;  %vm752_vm10 = vcmp.eq.f32.partialorder %v751_v56, 8.507059e+37 }
 0xa1c   :  { %v1584_v38 = vpop.eup %1583 }
 0xa1d   :  { %v728_v39 = vmul.f32 %v1584_v38, %v725_v35  ;;  %v1586_v41 = vpop.eup %1585  ;;  %vm733_vm3 = vweird.f32 %v1584_v38 }
 0xa1e   :  { %v743_v43 = vmul.f32 %v1586_v41, %v726_v37  ;;  %vm734_vm5 = vmor %vm732_vm4, %vm733_vm3  ;;  %vm748_vm7 = vweird.f32 %v1586_v41 }
 0xa1f   :  { %v729_v40 = vsub.f32 1.0, %v728_v39  ;;  %vm749_vm9 = vmor %vm747_vm8, %vm748_vm7 }
 0xa20   :  { %v744_v45 = vsub.f32 1.0, %v743_v43 }
 0xa21   :  { %v730_v42 = vmul.f32 %v1584_v38, %v729_v40 }
 0xa22   :  { %v745_v49 = vmul.f32 %v1586_v41, %v744_v45 }
 0xa23   :  { %v731_v44 = vadd.f32 %v1584_v38, %v730_v42 }
 0xa24   :  { %v746_v54 = vadd.f32 %v1586_v41, %v745_v49 }
 0xa25   :  { %v735_v48 = vsel %vm734_vm5, %v1584_v38, %v731_v44 }
 0xa26   :  { %v740_v52 = vsel %vm737_vm6, %v739_v50, %v735_v48  ;;  %v750_v57 = vsel %vm749_vm9, %v1586_v41, %v746_v54 }
 0xa27   :  { %v755_v59 = vsel %vm752_vm10, %v754_v58, %v750_v57  ;;  %v767_v11 = vmul.f32 %v762_v1, %v740_v52 }
 0xa7d   :  { %v772_v51 = vpop.permute.xlu0 %771 }
 0xa7e   :  { %v777_v53 = vmul.f32 %v772_v51, %v740_v52 }
 0xa80   :  { %781 = vrot.lane.b32.xlu1 %v777_v53, %s1639_s2 }
 0xa85   :  { %v774_v60 = vpop.permute.xlu1 %773  ;;  %v764_v4 = vpop.permute.xlu0 %763 }
 0xa86   :  { %v778_v0 = vmul.f32 %v774_v60, %v755_v59  ;;  %v768_v5 = vmul.f32 %v764_v4, %v755_v59 }
 0xa88   :  { %783 = vrot.lane.b32.xlu2 %v778_v0, %s1639_s2 }
 0xae2   :  { %v784_v7 = vpop.permute.xlu2 %783 }
 0xae3   :  { %v788_v8 = vadd.f32 %v784_v7, %v768_v5 }
 0xae5   :  { %1587 = vtanh.f32 %v788_v8 }
 0xaeb   :  { %v1588_v10 = vpop.eup %1587 }
 0xaec   :  { %795 = vrot.lane.b32.xlu1 %v1588_v10, %s1639_s2 }
 0xaf2   :  { %v782_v13 = vpop.permute.xlu1 %781 }
 0xaf3   :  { %v787_v14 = vadd.f32 %v782_v13, %v767_v11 }
 0xaf5   :  { %1589 = vtanh.f32 %v787_v14  ;;  %813 = vrot.lane.b32.xlu1 %v787_v14, %s1640_s10 }
 0xafb   :  { %v1590_v15 = vpop.eup %1589 }
 0xafc   :  { %793 = vrot.lane.b32.xlu0 %v1590_v15, %s1639_s2 }
 0xb5e   :  { %v796_v16 = vpop.permute.xlu1 %795 }
 0xb5f   :  { %v1840_v17 = vmul.f32 %v796_v16, %v755_v59 }
 0xb61   :  { %805 = vrot.lane.b32.xlu0 %v1840_v17, %s1641_s11 }
 0xb67   :  { %v814_v18 = vpop.permute.xlu1 %813 }
 0xb68   :  { %819 = vst.msk [vmem:[#allocation3] sm:$0xff] %vm27_vm0, %v814_v18 }
 0xb6e   :  { %v794_v19 = vpop.permute.xlu0 %793 }
 0xb6f   :  { %v1845_v20 = vmul.f32 %v794_v19, %v740_v52  ;;  %v836_v21 = vld [vmem:[#allocation3] sm:$0xff] }
 0xb71   :  { %803 = vrot.lane.b32.xlu2 %v1845_v20, %s1641_s11 }
 0xb79   :  { %815 = vrot.lane.b32.xlu2 %v788_v8, %s1640_s10 }
 0xb81   :  { %921 = vrot.lane.b32.xlu2 %v836_v21, %s1639_s2 }
 0xbcb   :  { %v804_v24 = vpop.permute.xlu2 %803 }
 0xbcc   :  { %809 = vst.msk [vmem:[#allocation2] sm:$0xff] %vm27_vm0, %v804_v24 }
 0xbd3   :  { %v816_v25 = vpop.permute.xlu2 %815  ;;  %v806_v26 = vpop.permute.xlu0 %805  ;;  %v834_v27 = vld [vmem:[#allocation2] sm:$0xff] }
 0xbd4   :  { %820 = vst.msk [vmem:[#allocation3 + $0x8] sm:$0xff] %vm27_vm0, %v816_v25 }
 0xbd5   :  { %810 = vst.msk [vmem:[#allocation2 + $0x8] sm:$0xff] %vm27_vm0, %v806_v26 }
 0xbdb   :  { %v837_v39 = vld [vmem:[#allocation3 + $0x8] sm:$0xff]  ;;  %v922_v14 = vpop.permute.xlu2 %921 }
 0xbdc   :  { %v835_v28 = vld [vmem:[#allocation2 + $0x8] sm:$0xff] }
 0xbdd   :  { %v841_v29 = vpack.c.bf16 %v835_v28, %v834_v27 }
 0xbdf   :  { %1418 = vmatmul.msk.bf16.vlgmr.msrb.gmra.mxu1 %vm27_vm0, %v841_v29 }
 0xc5c   :  { %v870_v32 = vpop.f32.mrf.mxu1 }
 0xc5d   :  { %v877_v33 = vadd.f32 %v1491_v31, %v870_v32  ;;  %v1466_v32 = vld [vmem:[%s2072_s1 + $0x8] sm:$0xff] }
 0xc5e   :  { %1027 = vmatpush.bf16.msrb.mxu2 %v1466_v32 }
 0xc5f   :  { %1591 = vtanh.f32 %v877_v33  ;;  %v1419_v40 = vmul.f32 -1.442695, %v877_v33  ;;  %v1465_v33 = vld [vmem:[%s2072_s1] sm:$0xff] }
 0xc62   :  { %1028 = vmatpush.bf16.msrb.mxu2 %v1465_v33 }
 0xc64   :  { %v872_v35 = vpop.f32.mrf.mxu1 }
 0xc65   :  { %v1592_v36 = vpop.eup %1591  ;;  %v878_v37 = vadd.f32 %v1492_v34, %v872_v35 }
 0xc66   :  { %931 = vrot.lane.b32.xlu0 %v1592_v36, %s1639_s2 }
 0xc67   :  { %1593 = vtanh.f32 %v878_v37  ;;  %v1420_v41 = vmul.f32 -1.442695, %v878_v37 }
 0xc68   :  { %1595 = vpow2.f32 %v1419_v40  ;;  %v1506_v40 = vld [vmem:[%s2075_s0 + $0x30] sm:$0xff]  }
 0xc69   :  { %1597 = vpow2.f32 %v1420_v41  ;;  %v1495_v41 = vunpack.c.l.bf16 %v1506_v40 }
 0xc6d   :  { %v1594_v38 = vpop.eup %1593 }
 0xc6e   :  { %923 = vrot.lane.b32.xlu0 %v837_v39, %s1639_s2  ;;  %933 = vrot.lane.b32.xlu1 %v1594_v38, %s1639_s2  ;;  %v1596_v42 = vpop.eup %1595 }
 0xc6f   :  { %v885_v43 = vadd.f32 1.0, %v1596_v42  ;;  %v1598_v44 = vpop.eup %1597 }
 0xc70   :  { %v886_v45 = vadd.f32 1.0, %v1598_v44  ;;  %v1496_v44 = vunpack.c.h.bf16 %v1506_v40 }
 0xc71   :  { %1599 = vrcp.f32 %v885_v43  ;;  %v898_v54 = vand.u32 2147483648, %v885_v43  ;;  %vm892_vm12 = vweird.f32 %v885_v43  ;;  %v896_v55 = vand.u32 2147483647, %v885_v43 }
 0xc72   :  { %1601 = vrcp.f32 %v886_v45  ;;  %v913_v4 = vand.u32 2147483648, %v886_v45  ;;  %vm907_vm1 = vweird.f32 %v886_v45  ;;  %v911_v5 = vand.u32 2147483647, %v886_v45 }
 0xc73   :  { %v899_v58 = vor.u32 1.1754944e-38, %v898_v54  ;;  %vm897_vm14 = vcmp.eq.f32.partialorder %v896_v55, 8.507059e+37 }
 0xc74   :  { %v914_v8 = vor.u32 1.1754944e-38, %v913_v4  ;;  %vm912_vm3 = vcmp.eq.f32.partialorder %v911_v5, 8.507059e+37 }
 0xc77   :  { %v1600_v46 = vpop.eup %1599 }
 0xc78   :  { %v888_v47 = vmul.f32 %v1600_v46, %v885_v43  ;;  %v1602_v49 = vpop.eup %1601  ;;  %vm893_vm11 = vweird.f32 %v1600_v46 }
 0xc79   :  { %v903_v51 = vmul.f32 %v1602_v49, %v886_v45  ;;  %vm894_vm13 = vmor %vm892_vm12, %vm893_vm11  ;;  %vm908_vm15 = vweird.f32 %v1602_v49 }
 0xc7a   :  { %v889_v48 = vsub.f32 1.0, %v888_v47  ;;  %vm909_vm2 = vmor %vm907_vm1, %vm908_vm15 }
 0xc7b   :  { %v904_v53 = vsub.f32 1.0, %v903_v51 }
 0xc7c   :  { %v890_v50 = vmul.f32 %v1600_v46, %v889_v48 }
 0xc7d   :  { %v905_v57 = vmul.f32 %v1602_v49, %v904_v53 }
 0xc7e   :  { %v891_v52 = vadd.f32 %v1600_v46, %v890_v50 }
 0xc7f   :  { %v906_v1 = vadd.f32 %v1602_v49, %v905_v57 }
 0xc80   :  { %v895_v56 = vsel %vm894_vm13, %v1600_v46, %v891_v52 }
 0xc81   :  { %v900_v60 = vsel %vm897_vm14, %v899_v58, %v895_v56  ;;  %v910_v7 = vsel %vm909_vm2, %v1602_v49, %v906_v1 }
 0xc82   :  { %v915_v10 = vsel %vm912_vm3, %v914_v8, %v910_v7  ;;  %v927_v22 = vmul.f32 %v922_v14, %v900_v60 }
 0xcd8   :  { %v932_v59 = vpop.permute.xlu0 %931 }
 0xcd9   :  { %v937_v0 = vmul.f32 %v932_v59, %v900_v60 }
 0xcdb   :  { %941 = vrot.lane.b32.xlu1 %v937_v0, %s1639_s2 }
 0xce0   :  { %v934_v11 = vpop.permute.xlu1 %933  ;;  %v924_v15 = vpop.permute.xlu0 %923 }
 0xce1   :  { %v938_v13 = vmul.f32 %v934_v11, %v915_v10  ;;  %v928_v16 = vmul.f32 %v924_v15, %v915_v10 }
 0xce3   :  { %943 = vrot.lane.b32.xlu2 %v938_v13, %s1639_s2 }
 0xd3d   :  { %v944_v18 = vpop.permute.xlu2 %943 }
 0xd3e   :  { %v948_v19 = vadd.f32 %v944_v18, %v928_v16 }
 0xd40   :  { %1603 = vtanh.f32 %v948_v19 }
 0xd46   :  { %v1604_v21 = vpop.eup %1603 }
 0xd47   :  { %955 = vrot.lane.b32.xlu1 %v1604_v21, %s1639_s2 }
 0xd4d   :  { %v942_v23 = vpop.permute.xlu1 %941 }
 0xd4e   :  { %v947_v24 = vadd.f32 %v942_v23, %v927_v22 }
 0xd50   :  { %1605 = vtanh.f32 %v947_v24  ;;  %973 = vrot.lane.b32.xlu1 %v947_v24, %s1640_s10 }
 0xd56   :  { %v1606_v25 = vpop.eup %1605 }
 0xd57   :  { %953 = vrot.lane.b32.xlu0 %v1606_v25, %s1639_s2 }
 0xdb9   :  { %v956_v26 = vpop.permute.xlu1 %955 }
 0xdba   :  { %v1872_v27 = vmul.f32 %v956_v26, %v915_v10 }
 0xdbc   :  { %965 = vrot.lane.b32.xlu0 %v1872_v27, %s1641_s11 }
 0xdc2   :  { %v974_v28 = vpop.permute.xlu1 %973 }
 0xdc3   :  { %979 = vst.msk [vmem:[#allocation3] sm:$0xff] %vm27_vm0, %v974_v28 }
 0xdc9   :  { %v954_v29 = vpop.permute.xlu0 %953 }
 0xdca   :  { %v1877_v30 = vmul.f32 %v954_v29, %v900_v60  ;;  %v996_v31 = vld [vmem:[#allocation3] sm:$0xff] }
 0xdcc   :  { %963 = vrot.lane.b32.xlu2 %v1877_v30, %s1641_s11 }
 0xdd4   :  { %975 = vrot.lane.b32.xlu2 %v948_v19, %s1640_s10 }
 0xddc   :  { %1081 = vrot.lane.b32.xlu2 %v996_v31, %s1639_s2 }
 0xe26   :  { %v964_v34 = vpop.permute.xlu2 %963 }
 0xe27   :  { %969 = vst.msk [vmem:[#allocation2] sm:$0xff] %vm27_vm0, %v964_v34 }
 0xe2e   :  { %v976_v35 = vpop.permute.xlu2 %975  ;;  %v966_v36 = vpop.permute.xlu0 %965  ;;  %v994_v37 = vld [vmem:[#allocation2] sm:$0xff] }
 0xe2f   :  { %980 = vst.msk [vmem:[#allocation3 + $0x8] sm:$0xff] %vm27_vm0, %v976_v35 }
 0xe30   :  { %970 = vst.msk [vmem:[#allocation2 + $0x8] sm:$0xff] %vm27_vm0, %v966_v36 }
 0xe36   :  { %v997_v49 = vld [vmem:[#allocation3 + $0x8] sm:$0xff]  ;;  %v1082_v26 = vpop.permute.xlu2 %1081 }
 0xe37   :  { %v995_v38 = vld [vmem:[#allocation2 + $0x8] sm:$0xff] }
 0xe38   :  { %v1001_v39 = vpack.c.bf16 %v995_v38, %v994_v37 }
 0xe3a   :  { %1433 = vmatmul.msk.bf16.vlgmr.msrb.gmra.mxu2 %vm27_vm0, %v1001_v39 }
 0xebd   :  { %v1030_v42 = vpop.f32.mrf.mxu2 }
 0xebe   :  { %v1037_v43 = vadd.f32 %v1495_v41, %v1030_v42 }
 0xec0   :  { %1607 = vtanh.f32 %v1037_v43  ;;  %v1434_v50 = vmul.f32 -1.442695, %v1037_v43 }
 0xec5   :  { %v1032_v45 = vpop.f32.mrf.mxu2 }
 0xec6   :  { %v1608_v46 = vpop.eup %1607  ;;  %v1038_v47 = vadd.f32 %v1496_v44, %v1032_v45  ;;  %v1468_v44 = vld [vmem:[%s2072_s1 + $0x8] sm:$0xff]  ;;  %v1467_v45 = vld [vmem:[%s2072_s1] sm:$0xff] }
 0xec7   :  { %1091 = vrot.lane.b32.xlu0 %v1608_v46, %s1639_s2  ;;  %1187 = vmatpush.bf16.msrb.mxu3 %v1468_v44  ;;  %v502_v44 = vpack.c.bf16 %v1776_v3, %v1776_v3 }
 0xec8   :  { %1609 = vtanh.f32 %v1038_v47  ;;  %v1435_v51 = vmul.f32 -1.442695, %v1038_v47 }
 0xec9   :  { %1611 = vpow2.f32 %v1434_v50 }
 0xeca   :  { %1613 = vpow2.f32 %v1435_v51 }
 0xecb   :  { %1188 = vmatpush.bf16.msrb.mxu3 %v1467_v45  ;;  %v821_v45 = vpack.c.bf16 %v1845_v20, %v1845_v20 }
 0xece   :  { %v1610_v48 = vpop.eup %1609 }
 0xecf   :  { %1083 = vrot.lane.b32.xlu0 %v997_v49, %s1639_s2  ;;  %1093 = vrot.lane.b32.xlu1 %v1610_v48, %s1639_s2  ;;  %v1612_v52 = vpop.eup %1611 }
 0xed0   :  { %v1045_v53 = vadd.f32 1.0, %v1612_v52  ;;  %v1614_v54 = vpop.eup %1613  ;;  %v1507_v52 = vld [vmem:[%s2075_s0 + $0x38] sm:$0xff]  }
 0xed1   :  { %v1046_v55 = vadd.f32 1.0, %v1614_v54 }
 0xed2   :  { %1615 = vrcp.f32 %v1045_v53  ;;  %v1058_v5 = vand.u32 2147483648, %v1045_v53  ;;  %vm1052_vm5 = vweird.f32 %v1045_v53  ;;  %v1056_v7 = vand.u32 2147483647, %v1045_v53 }
 0xed3   :  { %1617 = vrcp.f32 %v1046_v55  ;;  %v1073_v18 = vand.u32 2147483648, %v1046_v55  ;;  %vm1067_vm9 = vweird.f32 %v1046_v55  ;;  %v1071_v19 = vand.u32 2147483647, %v1046_v55 }
 0xed4   :  { %v1059_v11 = vor.u32 1.1754944e-38, %v1058_v5  ;;  %vm1057_vm7 = vcmp.eq.f32.partialorder %v1056_v7, 8.507059e+37 }
 0xed5   :  { %v1074_v22 = vor.u32 1.1754944e-38, %v1073_v18  ;;  %vm1072_vm11 = vcmp.eq.f32.partialorder %v1071_v19, 8.507059e+37 }
 0xed8   :  { %v1616_v56 = vpop.eup %1615 }
 0xed9   :  { %v1048_v57 = vmul.f32 %v1616_v56, %v1045_v53  ;;  %v1618_v59 = vpop.eup %1617  ;;  %vm1053_vm4 = vweird.f32 %v1616_v56  ;;  %v1499_v53 = vunpack.c.l.bf16 %v1507_v52 }
 0xeda   :  { %v1063_v0 = vmul.f32 %v1618_v59, %v1046_v55  ;;  %vm1054_vm6 = vmor %vm1052_vm5, %vm1053_vm4  ;;  %vm1068_vm8 = vweird.f32 %v1618_v59  ;;  %vm191_vm5 = vcmask 257024  }
 0xedb   :  { %v1049_v58 = vsub.f32 1.0, %v1048_v57  ;;  %vm1069_vm10 = vmor %vm1067_vm9, %vm1068_vm8 }
 0xedc   :  { %v1064_v4 = vsub.f32 1.0, %v1063_v0 }
 0xedd   :  { %v1050_v60 = vmul.f32 %v1616_v56, %v1049_v58 }
 0xede   :  { %v1065_v10 = vmul.f32 %v1618_v59, %v1064_v4 }
 0xedf   :  { %v1051_v1 = vadd.f32 %v1616_v56, %v1050_v60 }
 0xee0   :  { %v1066_v16 = vadd.f32 %v1618_v59, %v1065_v10 }
 0xee1   :  { %v1055_v8 = vsel %vm1054_vm6, %v1616_v56, %v1051_v1  ;;  %v1500_v56 = vunpack.c.h.bf16 %v1507_v52 }
 0xee2   :  { %v1060_v14 = vsel %vm1057_vm7, %v1059_v11, %v1055_v8  ;;  %v1070_v21 = vsel %vm1069_vm10, %v1618_v59, %v1066_v16 }
 0xee3   :  { %v1075_v23 = vsel %vm1072_vm11, %v1074_v22, %v1070_v21  ;;  %v1087_v34 = vmul.f32 %v1082_v26, %v1060_v14 }
 0xf39   :  { %v1092_v13 = vpop.permute.xlu0 %1091 }
 0xf3a   :  { %v1097_v15 = vmul.f32 %v1092_v13, %v1060_v14 }
 0xf3c   :  { %1101 = vrot.lane.b32.xlu1 %v1097_v15, %s1639_s2 }
 0xf41   :  { %v1094_v24 = vpop.permute.xlu1 %1093  ;;  %v1084_v28 = vpop.permute.xlu0 %1083 }
 0xf42   :  { %v1098_v25 = vmul.f32 %v1094_v24, %v1075_v23  ;;  %v1088_v29 = vmul.f32 %v1084_v28, %v1075_v23 }
 0xf44   :  { %1103 = vrot.lane.b32.xlu2 %v1098_v25, %s1639_s2 }
 0xf9e   :  { %v1104_v31 = vpop.permute.xlu2 %1103 }
 0xf9f   :  { %v1108_v32 = vadd.f32 %v1104_v31, %v1088_v29 }
 0xfa1   :  { %1619 = vtanh.f32 %v1108_v32 }
 0xfa7   :  { %v1620_v33 = vpop.eup %1619 }
 0xfa8   :  { %1115 = vrot.lane.b32.xlu1 %v1620_v33, %s1639_s2 }
 0xfae   :  { %v1102_v35 = vpop.permute.xlu1 %1101 }
 0xfaf   :  { %v1107_v36 = vadd.f32 %v1102_v35, %v1087_v34 }
 0xfb1   :  { %1621 = vtanh.f32 %v1107_v36  ;;  %1133 = vrot.lane.b32.xlu1 %v1107_v36, %s1640_s10 }
 0xfb7   :  { %v1622_v37 = vpop.eup %1621 }
 0xfb8   :  { %1113 = vrot.lane.b32.xlu0 %v1622_v37, %s1639_s2 }
0x101a   :  { %v1116_v38 = vpop.permute.xlu1 %1115 }
0x101b   :  { %v1904_v39 = vmul.f32 %v1116_v38, %v1075_v23 }
0x101d   :  { %1125 = vrot.lane.b32.xlu0 %v1904_v39, %s1641_s11 }
0x1023   :  { %v1134_v40 = vpop.permute.xlu1 %1133 }
0x1024   :  { %1139 = vst.msk [vmem:[#allocation3] sm:$0xff] %vm27_vm0, %v1134_v40 }
0x102a   :  { %v1114_v41 = vpop.permute.xlu0 %1113 }
0x102b   :  { %v1909_v42 = vmul.f32 %v1114_v41, %v1060_v14  ;;  %v1156_v43 = vld [vmem:[#allocation3] sm:$0xff]  ;;  %v181_v41 = vpack.c.bf16 %v1712_v61, %v1712_v61  ;;  %v982_v61 = vpack.c.bf16 %v1872_v27, %v1872_v27  ;;  %v341_v27 = vpack.c.bf16 %v1749_v2, %v1749_v2 }
0x102c   :  { %v182_v2 = vpack.c.bf16 %v1716_v63, %v1716_v63 }
0x102d   :  { %1123 = vrot.lane.b32.xlu2 %v1909_v42, %s1641_s11 }
0x1035   :  { %1135 = vrot.lane.b32.xlu2 %v1108_v32, %s1640_s10 }
0x103d   :  { %1241 = vrot.lane.b32.xlu2 %v1156_v43, %s1639_s2  ;;  %v342_v43 = vpack.c.bf16 %v1744_v62, %v1744_v62 }
0x1087   :  { %v1124_v46 = vpop.permute.xlu2 %1123 }
0x1088   :  { %1129 = vst.msk [vmem:[#allocation2] sm:$0xff] %vm27_vm0, %v1124_v46 }
0x108f   :  { %v1136_v47 = vpop.permute.xlu2 %1135  ;;  %v1126_v48 = vpop.permute.xlu0 %1125  ;;  %v1154_v49 = vld [vmem:[#allocation2] sm:$0xff] }
0x1090   :  { %1140 = vst.msk [vmem:[#allocation3 + $0x8] sm:$0xff] %vm27_vm0, %v1136_v47 }
0x1091   :  { %1130 = vst.msk [vmem:[#allocation2 + $0x8] sm:$0xff] %vm27_vm0, %v1126_v48 }
0x1097   :  { %v1157_v0 = vld [vmem:[#allocation3 + $0x8] sm:$0xff]  ;;  %v1242_v46 = vpop.permute.xlu2 %1241 }
0x1098   :  { %v1155_v50 = vld [vmem:[#allocation2 + $0x8] sm:$0xff] }
0x1099   :  { %v1161_v51 = vpack.c.bf16 %v1155_v50, %v1154_v49 }
0x109b   :  { %1448 = vmatmul.msk.bf16.vlgmr.msrb.gmra.mxu3 %vm27_vm0, %v1161_v51 }
0x111e   :  { %v1190_v54 = vpop.f32.mrf.mxu3 }
0x111f   :  { %v1197_v55 = vadd.f32 %v1499_v53, %v1190_v54 }
0x1121   :  { %1623 = vtanh.f32 %v1197_v55  ;;  %v1449_v1 = vmul.f32 -1.442695, %v1197_v55 }
0x1126   :  { %v1192_v57 = vpop.f32.mrf.mxu3 }
0x1127   :  { %v1624_v58 = vpop.eup %1623  ;;  %v1198_v59 = vadd.f32 %v1500_v56, %v1192_v57  ;;  %v662_v56 = vpack.c.bf16 %v1808_v9, %v1808_v9  ;;  %v661_v9 = vpack.c.bf16 %v1813_v12, %v1813_v12 }
0x1128   :  { %1251 = vrot.lane.b32.xlu0 %v1624_v58, %s1639_s2  ;;  %v501_v58 = vpack.c.bf16 %v1781_v6, %v1781_v6  ;;  %v822_v6 = vpack.c.bf16 %v1840_v17, %v1840_v17 }
0x1129   :  { %1625 = vtanh.f32 %v1198_v59  ;;  %v1450_v4 = vmul.f32 -1.442695, %v1198_v59  ;;  %v981_v59 = vpack.c.bf16 %v1877_v30, %v1877_v30  ;;  %v1141_v30 = vpack.c.bf16 %v1909_v42, %v1909_v42 }
0x112a   :  { %1627 = vpow2.f32 %v1449_v1 }
0x112b   :  { %1629 = vpow2.f32 %v1450_v4 }
0x112f   :  { %v1626_v60 = vpop.eup %1625 }
0x1130   :  { %1243 = vrot.lane.b32.xlu0 %v1157_v0, %s1639_s2  ;;  %1253 = vrot.lane.b32.xlu1 %v1626_v60, %s1639_s2  ;;  %v1628_v5 = vpop.eup %1627 }
0x1131   :  { %v1205_v7 = vadd.f32 1.0, %v1628_v5  ;;  %v1630_v8 = vpop.eup %1629 }
0x1132   :  { %v1206_v10 = vadd.f32 1.0, %v1630_v8 }
0x1133   :  { %1631 = vrcp.f32 %v1205_v7  ;;  %v1218_v22 = vand.u32 2147483648, %v1205_v7  ;;  %vm1212_vm13 = vweird.f32 %v1205_v7  ;;  %v1216_v23 = vand.u32 2147483647, %v1205_v7 }
0x1134   :  { %1633 = vrcp.f32 %v1206_v10  ;;  %v1233_v33 = vand.u32 2147483648, %v1206_v10  ;;  %vm1227_vm2 = vweird.f32 %v1206_v10  ;;  %v1231_v34 = vand.u32 2147483647, %v1206_v10 }
0x1135   :  { %v1219_v26 = vor.u32 1.1754944e-38, %v1218_v22  ;;  %vm1217_vm15 = vcmp.eq.f32.partialorder %v1216_v23, 8.507059e+37 }
0x1136   :  { %v1234_v36 = vor.u32 1.1754944e-38, %v1233_v33  ;;  %vm1232_vm4 = vcmp.eq.f32.partialorder %v1231_v34, 8.507059e+37 }
0x1139   :  { %v1632_v11 = vpop.eup %1631 }
0x113a   :  { %v1208_v13 = vmul.f32 %v1632_v11, %v1205_v7  ;;  %v1634_v15 = vpop.eup %1633  ;;  %vm1213_vm12 = vweird.f32 %v1632_v11 }
0x113b   :  { %v1223_v18 = vmul.f32 %v1634_v15, %v1206_v10  ;;  %vm1214_vm14 = vmor %vm1212_vm13, %vm1213_vm12  ;;  %vm1228_vm1 = vweird.f32 %v1634_v15 }
0x113c   :  { %v1209_v14 = vsub.f32 1.0, %v1208_v13  ;;  %vm1229_vm3 = vmor %vm1227_vm2, %vm1228_vm1 }
0x113d   :  { %v1224_v21 = vsub.f32 1.0, %v1223_v18 }
0x113e   :  { %v1210_v16 = vmul.f32 %v1632_v11, %v1209_v14 }
0x113f   :  { %v1225_v25 = vmul.f32 %v1634_v15, %v1224_v21 }
0x1140   :  { %v1211_v19 = vadd.f32 %v1632_v11, %v1210_v16 }
0x1141   :  { %v1226_v32 = vadd.f32 %v1634_v15, %v1225_v25 }
0x1142   :  { %v1215_v24 = vsel %vm1214_vm14, %v1632_v11, %v1211_v19  ;;  %v1142_v11 = vpack.c.bf16 %v1904_v39, %v1904_v39 }
0x1143   :  { %v1931_v29 = vsel %vm1217_vm15, %v1219_v26, %v1215_v24  ;;  %v1230_v35 = vsel %vm1229_vm3, %v1634_v15, %v1226_v32 }
0x1144   :  { %v1235_v37 = vsel %vm1232_vm4, %v1234_v36, %v1230_v35  ;;  %v1247_v20 = vmul.f32 %v1242_v46, %v1931_v29 }
0x119a   :  { %v1252_v28 = vpop.permute.xlu0 %1251 }
0x119b   :  { %v1257_v31 = vmul.f32 %v1252_v28, %v1931_v29 }
0x119d   :  { %1261 = vrot.lane.b32.xlu1 %v1257_v31, %s1639_s2 }
0x11a2   :  { %v1254_v38 = vpop.permute.xlu1 %1253  ;;  %v1244_v47 = vpop.permute.xlu0 %1243 }
0x11a3   :  { %v1258_v40 = vmul.f32 %v1254_v38, %v1235_v37  ;;  %v1248_v62 = vmul.f32 %v1244_v47, %v1235_v37 }
0x11a5   :  { %1263 = vrot.lane.b32.xlu2 %v1258_v40, %s1639_s2 }
0x11ad   :  { %185 = vrot.lane.b32.xlu2 %v181_v41, %s1641_s11 }
0x11b5   :  { %347 = vrot.lane.b32.xlu2 %v342_v43, %s1641_s11 }
0x11bd   :  { %507 = vrot.lane.b32.xlu2 %v502_v44, %s1641_s11 }
0x11c5   :  { %825 = vrot.lane.b32.xlu2 %v821_v45, %s1641_s11 }
0x11cd   :  { %987 = vrot.lane.b32.xlu2 %v982_v61, %s1641_s11 }
0x11ff   :  { %v1264_v48 = vpop.permute.xlu2 %1263 }
0x1200   :  { %v1268_v49 = vadd.f32 %v1264_v48, %v1248_v62 }
0x1202   :  { %1635 = vtanh.f32 %v1268_v49 }
0x1207   :  { %v186_v3 = vpop.permute.xlu2 %185 }
0x1208   :  { %v1636_v50 = vpop.eup %1635  ;;  %192 = vst.msk [vmem:[%s2076_s4] sm:$0xf] %vm191_vm5, %v186_v3 }
0x1209   :  { %1275 = vrot.lane.b32.xlu1 %v1636_v50, %s1639_s2 }
0x120f   :  { %v348_v51 = vpop.permute.xlu2 %347  ;;  %v1262_v52 = vpop.permute.xlu1 %1261 }
0x1210   :  { %1362 = vst.msk [vmem:[%s2076_s4 + $0xc] sm:$0xf] %vm191_vm5, %v348_v51  ;;  %v1267_v53 = vadd.f32 %v1262_v52, %v1247_v20 }
0x1211   :  { %345 = vrot.lane.b32.xlu1 %v341_v27, %s1641_s11 }
0x1212   :  { %1637 = vtanh.f32 %v1267_v53 }
0x1217   :  { %v508_v54 = vpop.permute.xlu2 %507 }
0x1218   :  { %v1638_v55 = vpop.eup %1637  ;;  %1377 = vst.msk [vmem:[%s2076_s4 + $0x14] sm:$0xf] %vm191_vm5, %v508_v54 }
0x1219   :  { %1295 = vrot.lane.b32.xlu1 %v1268_v49, %s1640_s10  ;;  %1273 = vrot.lane.b32.xlu0 %v1638_v55, %s1639_s2 }
0x121f   :  { %v826_v57 = vpop.permute.xlu2 %825 }
0x1220   :  { %1406 = vst.msk [vmem:[%s2076_s4 + $0x20] sm:$0xf] %vm191_vm5, %v826_v57 }
0x1221   :  { %667 = vrot.lane.b32.xlu1 %v662_v56, %s1641_s11  ;;  %187 = vrot.lane.b32.xlu0 %v182_v2, %s1641_s11 }
0x1227   :  { %v988_v63 = vpop.permute.xlu2 %987 }
0x1228   :  { %1422 = vst.msk [vmem:[%s2076_s4 + $0x2c] sm:$0xf] %vm191_vm5, %v988_v63 }
0x1229   :  { %985 = vrot.lane.b32.xlu1 %v981_v59, %s1641_s11  ;;  %505 = vrot.lane.b32.xlu0 %v501_v58, %s1641_s11 }
0x1231   :  { %1293 = vrot.lane.b32.xlu0 %v1267_v53, %s1640_s10 }
0x1239   :  { %665 = vrot.lane.b32.xlu0 %v661_v9, %s1641_s11 }
0x1241   :  { %827 = vrot.lane.b32.xlu0 %v822_v6, %s1641_s11 }
0x1249   :  { %1145 = vrot.lane.b32.xlu0 %v1141_v30, %s1641_s11 }
0x127b   :  { %v1276_v60 = vpop.permute.xlu1 %1275 }
0x127c   :  { %v1280_v0 = vmul.f32 %v1276_v60, %v1235_v37 }
0x127e   :  { %v1302_v1 = vpack.c.bf16 %v1280_v0, %v1280_v0  ;;  %1285 = vrot.lane.b32.xlu2 %v1280_v0, %s1641_s11 }
0x1280   :  { %1307 = vrot.lane.b32.xlu0 %v1302_v1, %s1641_s11 }
0x1283   :  { %v346_v12 = vpop.permute.xlu1 %345 }
0x1284   :  { %1361 = vst.msk [vmem:[%s2076_s4 + $0x8] sm:$0xf] %vm191_vm5, %v346_v12 }
0x128b   :  { %v1274_v17 = vpop.permute.xlu0 %1273  ;;  %v1296_v4 = vpop.permute.xlu1 %1295 }
0x128c   :  { %v1279_v5 = vmul.f32 %v1274_v17, %v1931_v29  ;;  %1300 = vst.msk [vmem:[#allocation3 + $0x8] sm:$0xff] %vm27_vm0, %v1296_v4 }
0x128e   :  { %v1301_v42 = vpack.c.bf16 %v1279_v5, %v1279_v5  ;;  %1283 = vrot.lane.b32.xlu1 %v1279_v5, %s1641_s11 }
0x1290   :  { %1305 = vrot.lane.b32.xlu2 %v1301_v42, %s1641_s11 }
0x1293   :  { %v1322_v7 = vld [vmem:[#allocation3 + $0x8] sm:$0xff]  ;;  %v188_v8 = vpop.permute.xlu0 %187  ;;  %v668_v10 = vpop.permute.xlu1 %667 }
0x1294   :  { %1324 = vst.msk [vmem:[%s2077_s6 + $0x8] sm:$0xff] %vm27_vm0, %v1322_v7 }
0x1295   :  { %193 = vst.msk [vmem:[%s2076_s4 + $0x4] sm:$0xf] %vm191_vm5, %v188_v8 }
0x1296   :  { %1392 = vst.msk [vmem:[%s2076_s4 + $0x1c] sm:$0xf] %vm191_vm5, %v668_v10  ;;  %1147 = vrot.lane.b32.xlu1 %v1142_v11, %s1641_s11 }
0x129b   :  { %v506_v13 = vpop.permute.xlu0 %505  ;;  %v986_v14 = vpop.permute.xlu1 %985 }
0x129c   :  { %1376 = vst.msk [vmem:[%s2076_s4 + $0x10] sm:$0xf] %vm191_vm5, %v506_v13 }
0x129d   :  { %1421 = vst.msk [vmem:[%s2076_s4 + $0x28] sm:$0xf] %vm191_vm5, %v986_v14 }
0x12a3   :  { %v1294_v39 = vpop.permute.xlu0 %1293 }
0x12a4   :  { %1299 = vst.msk [vmem:[#allocation3] sm:$0xff] %vm27_vm0, %v1294_v39 }
0x12ab   :  { %v1321_v15 = vld [vmem:[#allocation3] sm:$0xff]  ;;  %v666_v16 = vpop.permute.xlu0 %665 }
0x12ac   :  { %1323 = vst.msk [vmem:[%s2077_s6] sm:$0xff] %vm27_vm0, %v1321_v15 }
0x12ad   :  { %1391 = vst.msk [vmem:[%s2076_s4 + $0x18] sm:$0xf] %vm191_vm5, %v666_v16 }
0x12b3   :  { %v828_v18 = vpop.permute.xlu0 %827 }
0x12b4   :  { %1407 = vst.msk [vmem:[%s2076_s4 + $0x24] sm:$0xf] %vm191_vm5, %v828_v18 }
0x12bb   :  { %v1146_v19 = vpop.permute.xlu0 %1145 }
0x12bc   :  { %1436 = vst.msk [vmem:[%s2076_s4 + $0x30] sm:$0xf] %vm191_vm5, %v1146_v19 }
0x12d8   :  { %v1286_v21 = vpop.permute.xlu2 %1285 }
0x12d9   :  { %1290 = vst.msk [vmem:[#allocation2 + $0x8] sm:$0xff] %vm27_vm0, %v1286_v21 }
0x12e0   :  { %v1318_v22 = vld [vmem:[#allocation2 + $0x8] sm:$0xff] }
0x12e1   :  { %1320 = vst.msk [vmem:[%s2078_s5 + $0x8] sm:$0xff] %vm27_vm0, %v1318_v22 }
0x12ea   :  { %v1306_v23 = vpop.permute.xlu2 %1305 }
0x12eb   :  { %1451 = vst.msk [vmem:[%s2076_s4 + $0x38] sm:$0xf] %vm191_vm5, %v1306_v23 }
0x12f2   :  { %v1308_v24 = vpop.permute.xlu0 %1307 }
0x12f3   :  { %1452 = vst.msk [vmem:[%s2076_s4 + $0x3c] sm:$0xf] %vm191_vm5, %v1308_v24 }
0x1300   :  { %v1284_v25 = vpop.permute.xlu1 %1283 }
0x1301   :  { %1289 = vst.msk [vmem:[#allocation2] sm:$0xff] %vm27_vm0, %v1284_v25 }
0x1308   :  { %v1317_v26 = vld [vmem:[#allocation2] sm:$0xff]  ;;  %v1148_v28 = vpop.permute.xlu1 %1147 }
0x1309   :  { %1319 = vst.msk [vmem:[%s2078_s5] sm:$0xff] %vm27_vm0, %v1317_v26 }
0x130a   :  { %1437 = vst.msk [vmem:[%s2076_s4 + $0x34] sm:$0xf] %vm191_vm5, %v1148_v28 }

</bundles_post_ra>
